<compile_context>
chip_gen: v7x
topology: tpu7x:2x2x1
jax: 0.10.0
libtpu: 0.0.40
codegen_flags: <defaults>
</compile_context>

<pallas_src>
import functools

import jax
import jax.numpy as jnp
from jax.experimental import pallas as pl
from jax.experimental.pallas import tpu as pltpu


def _round_up(n, m):
    return pl.cdiv(n, m) * m


def _default_act_dtype():
    """bf16 tanh on chips with bf16 VPU/EUP (v6e/v7x); f32 elsewhere."""
    try:
        kind = jax.devices()[0].device_kind.lower()
    except Exception:
        return jnp.float32
    if any(tag in kind for tag in ("v6", "v7", "7x", "trillium")):
        return jnp.bfloat16
    return jnp.float32


def _classifier_kernel(x_ref, w1_ref, b1_ref, w2_ref, b2_ref, w3_ref, b3_ref,
                       out_ref, *, act_dtype):
    # x_ref:  (TB, D)    f32 batch tile (D = 1200, full-array block)
    # w1_ref: (D, 512)   bf16     b1_ref: (1, 512)  f32
    # w2_ref: (512, 512) bf16     b2_ref: (1, 512)  f32
    # w3_ref: (512, 128) bf16 (cols 3..127 zero)    b3_ref: (1, 128) f32
    # out_ref: (TB, 128) bf16 (only cols 0..2 meaningful)
    x = x_ref[...].astype(jnp.bfloat16)      # in-kernel cast, no wrapper pass

    # Layer 1: bf16 matmul (compiler pads K=1200 internally), f32 accumulate,
    # bias in f32, tanh in act_dtype (bf16 on v6e/v7x, f32 on v5e).
    h1 = jnp.dot(x, w1_ref[...], preferred_element_type=jnp.float32)
    h1 = jnp.tanh((h1 + b1_ref[...]).astype(act_dtype)).astype(jnp.bfloat16)

    # Layer 2.
    h2 = jnp.dot(h1, w2_ref[...], preferred_element_type=jnp.float32)
    h2 = jnp.tanh((h2 + b2_ref[...]).astype(act_dtype)).astype(jnp.bfloat16)

    # Layer 3 (lane-padded to 128 output columns -> unmasked lane-dense store).
    out = jnp.dot(h2, w3_ref[...], preferred_element_type=jnp.float32)
    out_ref[...] = (out + b3_ref[...]).astype(out_ref.dtype)


def classifier_forward(x, params, *, tile_b=256, act_dtype=None):
    """Fused MLP classifier forward.

    x:      [B, input_dim] float32
    params: dict with w1 [D,512], b1 [512], w2 [512,512], b2 [512],
            w3 [512,3], b3 [3]
    returns [B, 3] float32
    """
    LANE = 128     # lane width
    SUB = 16       # batch-tile granularity (covers bf16/f32 sublane packs)

    B, D = x.shape
    H = params["w1"].shape[1]                 # 512
    C = params["w3"].shape[1]                 # 3
    C_pad = _round_up(C, LANE)                # 3 -> 128 (lane-dense output)

    if act_dtype is None:
        act_dtype = _default_act_dtype()

    # Batch tile: big enough to amortize per-step overhead and fill the MXU M
    # dimension on v6e/v7x, clamped for tiny batches; always a multiple of 16.
    tile_b = _round_up(max(int(tile_b), SUB), SUB)
    tile_b = min(tile_b, _round_up(B, SUB))
    grid = (pl.cdiv(B, tile_b),)

    # --- operand prep: weights only (x stays f32 / un-padded) ---------------
    w1 = params["w1"].astype(jnp.bfloat16)                       # (D, 512)
    w2 = params["w2"].astype(jnp.bfloat16)                       # (512, 512)
    w3 = jnp.pad(params["w3"].astype(jnp.bfloat16),
                 ((0, 0), (0, C_pad - C)))                       # (512, 128)
    b1r = params["b1"].reshape(1, H).astype(jnp.float32)
    b2r = params["b2"].reshape(1, H).astype(jnp.float32)
    b3r = jnp.pad(params["b3"].reshape(1, C).astype(jnp.float32),
                  ((0, 0), (0, C_pad - C)))

    # Grid-invariant operands: DMA'd once, no need for double buffering.
    const_buf = pl.Buffered(1)
    kernel = functools.partial(_classifier_kernel, act_dtype=act_dtype)

    out = pl.pallas_call(
        kernel,
        out_shape=jax.ShapeDtypeStruct((B, C_pad), jnp.bfloat16),
        grid_spec=pltpu.PrefetchScalarGridSpec(
            num_scalar_prefetch=0,
            grid=grid,
            in_specs=[
                # batch tile of the input (double-buffered by default);
                # last (partial) block is masked, garbage rows sliced off below
                pl.BlockSpec((tile_b, D), lambda i: (i, 0)),
                # weights / biases: full arrays, same block every grid step
                pl.BlockSpec((D, H), lambda i: (0, 0),
                             pipeline_mode=const_buf),
                pl.BlockSpec((1, H), lambda i: (0, 0),
                             pipeline_mode=const_buf),
                pl.BlockSpec((H, H), lambda i: (0, 0),
                             pipeline_mode=const_buf),
                pl.BlockSpec((1, H), lambda i: (0, 0),
                             pipeline_mode=const_buf),
                pl.BlockSpec((H, C_pad), lambda i: (0, 0),
                             pipeline_mode=const_buf),
                pl.BlockSpec((1, C_pad), lambda i: (0, 0),
                             pipeline_mode=const_buf),
            ],
            out_specs=pl.BlockSpec((tile_b, C_pad), lambda i: (i, 0)),
        ),
        compiler_params=pltpu.CompilerParams(
            dimension_semantics=("parallel",),
            vmem_limit_bytes=32 * 1024 * 1024,
        ),
    )(x.astype(jnp.float32), w1, b1r, w2, b2r, w3, b3r)

    return out[:, :C].astype(jnp.float32)


def init_classifier_params(input_dim, key):
    """Deterministic init matching nn.Linear default (uniform +/- 1/sqrt(fan_in))."""
    hidden, n_classes = 512, 3
    ks = jax.random.split(key, 6)

    def linear(kw, kb, fan_in, fan_out):
        bound = 1.0 / jnp.sqrt(fan_in)
        w = jax.random.uniform(kw, (fan_in, fan_out), jnp.float32, -bound, bound)
        b = jax.random.uniform(kb, (fan_out,), jnp.float32, -bound, bound)
        return w, b

    w1, b1 = linear(ks[0], ks[1], input_dim, hidden)
    w2, b2 = linear(ks[2], ks[3], hidden, hidden)
    w3, b3 = linear(ks[4], ks[5], hidden, n_classes)
    return {"w1": w1, "b1": b1, "w2": w2, "b2": b2, "w3": w3, "b3": b3}


def classifier_reference(x, p, *, bf16):
    """Pure-JAX reference. bf16=True mirrors the kernel's mixed precision."""
    if bf16:
        def dot(a, w):
            return jnp.dot(a.astype(jnp.bfloat16), w.astype(jnp.bfloat16),
                           preferred_element_type=jnp.float32)
    else:
        def dot(a, w):
            return jnp.dot(a, w, preferred_element_type=jnp.float32)
    h1 = jnp.tanh(dot(x, p["w1"]) + p["b1"])
    h2 = jnp.tanh(dot(h1, p["w2"]) + p["b2"])
    return dot(h2, p["w3"]) + p["b3"]


if __name__ == "__main__":
    key = jax.random.PRNGKey(0)
    k_param, k_x, k_x2 = jax.random.split(key, 3)

    input_dim = 4 * 300          # AWE embedding: [B, 1200]
    params = init_classifier_params(input_dim, k_param)

    # Small case matching the module docstring (B=2 -> single grid step,
    # partial batch block).
    x = jax.random.normal(k_x, (2, input_dim), jnp.float32)
    preds = jax.block_until_ready(classifier_forward(x, params))
    assert preds.shape == (2, 3)

    ref_bf16 = classifier_reference(x, params, bf16=True)
    ref_f32 = classifier_reference(x, params, bf16=False)
    assert jnp.allclose(preds, ref_bf16, atol=2e-2, rtol=2e-2), \
        "mismatch vs bf16 reference"
    assert jnp.allclose(preds, ref_f32, atol=5e-2, rtol=5e-2), \
        "mismatch vs f32 reference (beyond bf16 tolerance)"

    # Larger batch: exercises a multi-step (parallel) grid with a partial
    # trailing batch block (300 rows, tile 256 -> 2 grid steps).
    x2 = jax.random.normal(k_x2, (300, input_dim), jnp.float32)
    preds2 = jax.block_until_ready(classifier_forward(x2, params))
    assert preds2.shape == (300, 3)
    ref2 = classifier_reference(x2, params, bf16=True)
    assert jnp.allclose(preds2, ref2, atol=2e-2, rtol=2e-2), \
        "mismatch vs bf16 reference (batched)"

    print("KERNEL_OK")
</pallas_src>

<mosaic_0001>
module attributes {stable_mosaic.version = 11 : i64} {
  func.func @_classifier_kernel(%arg0: i32, %arg1: memref<16x1200xf32, #tpu.memory_space<vmem>>, %arg2: memref<1200x512xbf16, #tpu.memory_space<vmem>>, %arg3: memref<1x512xf32, #tpu.memory_space<vmem>>, %arg4: memref<512x512xbf16, #tpu.memory_space<vmem>>, %arg5: memref<1x512xf32, #tpu.memory_space<vmem>>, %arg6: memref<512x128xbf16, #tpu.memory_space<vmem>>, %arg7: memref<1x128xf32, #tpu.memory_space<vmem>>, %arg8: memref<16x128xbf16, #tpu.memory_space<vmem>>) attributes {dimension_semantics = [#tpu.dimension_semantics<parallel>], iteration_bounds = array<i64: 1>, scalar_prefetch = 0 : i64, scratch_operands = 0 : i64, tpu.core_type = #tpu.core_type<tc>, window_params = [{transform_indices = @transform_0, window_bounds = array<i64: 16, 1200>}, {pipeline_mode = #tpu.pipeline_mode<synchronous>, transform_indices = @transform_1, window_bounds = array<i64: 1200, 512>}, {pipeline_mode = #tpu.pipeline_mode<synchronous>, transform_indices = @transform_2, window_bounds = array<i64: 1, 512>}, {pipeline_mode = #tpu.pipeline_mode<synchronous>, transform_indices = @transform_3, window_bounds = array<i64: 512, 512>}, {pipeline_mode = #tpu.pipeline_mode<synchronous>, transform_indices = @transform_4, window_bounds = array<i64: 1, 512>}, {pipeline_mode = #tpu.pipeline_mode<synchronous>, transform_indices = @transform_5, window_bounds = array<i64: 512, 128>}, {pipeline_mode = #tpu.pipeline_mode<synchronous>, transform_indices = @transform_6, window_bounds = array<i64: 1, 128>}, {transform_indices = @transform_7, window_bounds = array<i64: 16, 128>}]} {
    %c0 = arith.constant 0 : index
    %c0_0 = arith.constant 0 : index
    %0 = vector.load %arg1[%c0, %c0_0] : memref<16x1200xf32, #tpu.memory_space<vmem>>, vector<16x1200xf32>
    %1 = arith.truncf %0 : vector<16x1200xf32> to vector<16x1200xbf16>
    %c0_1 = arith.constant 0 : index
    %c0_2 = arith.constant 0 : index
    %2 = vector.load %arg2[%c0_1, %c0_2] : memref<1200x512xbf16, #tpu.memory_space<vmem>>, vector<1200x512xbf16>
    %cst = arith.constant dense<0.000000e+00> : vector<16x512xf32>
    %3 = tpu.matmul %1, %2, %cst {dimension_numbers = #tpu.dot_dimension_numbers<[1], [0], [0], [1], [0, 0, 1, 1], [], []>} : vector<16x1200xbf16>, vector<1200x512xbf16>, vector<16x512xf32> -> vector<16x512xf32>
    %c0_3 = arith.constant 0 : index
    %c0_4 = arith.constant 0 : index
    %4 = vector.load %arg3[%c0_3, %c0_4] : memref<1x512xf32, #tpu.memory_space<vmem>>, vector<1x512xf32>
    %5 = vector.broadcast %4 : vector<1x512xf32> to vector<16x512xf32>
    %6 = arith.addf %3, %5 : vector<16x512xf32>
    %7 = math.tanh %6 : vector<16x512xf32>
    %8 = arith.truncf %7 : vector<16x512xf32> to vector<16x512xbf16>
    %c0_5 = arith.constant 0 : index
    %c0_6 = arith.constant 0 : index
    %9 = vector.load %arg4[%c0_5, %c0_6] : memref<512x512xbf16, #tpu.memory_space<vmem>>, vector<512x512xbf16>
    %cst_7 = arith.constant dense<0.000000e+00> : vector<16x512xf32>
    %10 = tpu.matmul %8, %9, %cst_7 {dimension_numbers = #tpu.dot_dimension_numbers<[1], [0], [0], [1], [0, 0, 1, 1], [], []>} : vector<16x512xbf16>, vector<512x512xbf16>, vector<16x512xf32> -> vector<16x512xf32>
    %c0_8 = arith.constant 0 : index
    %c0_9 = arith.constant 0 : index
    %11 = vector.load %arg5[%c0_8, %c0_9] : memref<1x512xf32, #tpu.memory_space<vmem>>, vector<1x512xf32>
    %12 = vector.broadcast %11 : vector<1x512xf32> to vector<16x512xf32>
    %13 = arith.addf %10, %12 : vector<16x512xf32>
    %14 = math.tanh %13 : vector<16x512xf32>
    %15 = arith.truncf %14 : vector<16x512xf32> to vector<16x512xbf16>
    %c0_10 = arith.constant 0 : index
    %c0_11 = arith.constant 0 : index
    %16 = vector.load %arg6[%c0_10, %c0_11] : memref<512x128xbf16, #tpu.memory_space<vmem>>, vector<512x128xbf16>
    %cst_12 = arith.constant dense<0.000000e+00> : vector<16x128xf32>
    %17 = tpu.matmul %15, %16, %cst_12 {dimension_numbers = #tpu.dot_dimension_numbers<[1], [0], [0], [1], [0, 0, 1, 1], [], []>} : vector<16x512xbf16>, vector<512x128xbf16>, vector<16x128xf32> -> vector<16x128xf32>
    %c0_13 = arith.constant 0 : index
    %c0_14 = arith.constant 0 : index
    %18 = vector.load %arg7[%c0_13, %c0_14] : memref<1x128xf32, #tpu.memory_space<vmem>>, vector<1x128xf32>
    %19 = vector.broadcast %18 : vector<1x128xf32> to vector<16x128xf32>
    %20 = arith.addf %17, %19 : vector<16x128xf32>
    %21 = arith.truncf %20 : vector<16x128xf32> to vector<16x128xbf16>
    %c0_15 = arith.constant 0 : index
    %c0_16 = arith.constant 0 : index
    %22 = vector.load %arg8[%c0_15, %c0_16] : memref<16x128xbf16, #tpu.memory_space<vmem>>, vector<16x128xbf16>
    tpu.vector_store %arg8[%c0_15, %c0_16], %21 {strides = array<i32>} : memref<16x128xbf16, #tpu.memory_space<vmem>>, vector<16x128xbf16>,
    return
  }
  func.func @transform_0(%arg0: i32) -> (i32, i32) {
    %c0_i32 = arith.constant 0 : i32
    %c0_i32_0 = arith.constant 0 : i32
    return %arg0, %c0_i32 : i32, i32
  }
  func.func @transform_1(%arg0: i32) -> (i32, i32) {
    %c0_i32 = arith.constant 0 : i32
    %c0_i32_0 = arith.constant 0 : i32
    %c0_i32_1 = arith.constant 0 : i32
    return %c0_i32, %c0_i32_0 : i32, i32
  }
  func.func @transform_2(%arg0: i32) -> (i32, i32) {
    %c0_i32 = arith.constant 0 : i32
    %c0_i32_0 = arith.constant 0 : i32
    %c0_i32_1 = arith.constant 0 : i32
    return %c0_i32, %c0_i32_0 : i32, i32
  }
  func.func @transform_3(%arg0: i32) -> (i32, i32) {
    %c0_i32 = arith.constant 0 : i32
    %c0_i32_0 = arith.constant 0 : i32
    %c0_i32_1 = arith.constant 0 : i32
    return %c0_i32, %c0_i32_0 : i32, i32
  }
  func.func @transform_4(%arg0: i32) -> (i32, i32) {
    %c0_i32 = arith.constant 0 : i32
    %c0_i32_0 = arith.constant 0 : i32
    %c0_i32_1 = arith.constant 0 : i32
    return %c0_i32, %c0_i32_0 : i32, i32
  }
  func.func @transform_5(%arg0: i32) -> (i32, i32) {
    %c0_i32 = arith.constant 0 : i32
    %c0_i32_0 = arith.constant 0 : i32
    %c0_i32_1 = arith.constant 0 : i32
    return %c0_i32, %c0_i32_0 : i32, i32
  }
  func.func @transform_6(%arg0: i32) -> (i32, i32) {
    %c0_i32 = arith.constant 0 : i32
    %c0_i32_0 = arith.constant 0 : i32
    %c0_i32_1 = arith.constant 0 : i32
    return %c0_i32, %c0_i32_0 : i32, i32
  }
  func.func @transform_7(%arg0: i32) -> (i32, i32) {
    %c0_i32 = arith.constant 0 : i32
    %c0_i32_0 = arith.constant 0 : i32
    return %arg0, %c0_i32 : i32, i32
  }
}

</mosaic_0001>

<bundles_post_ra>
// kernel: tpu_custom_call.1
= control target key start
LH: loop header
LB: loop body
LE: loop exit
PB: predicated region body
PF: predicated region fallthrough
CT: control target
= control target key end

     0   :  { %12 = vsyncpa [#allocation3], 0  ;;  %s5825_s0 = inlined_call_operand.hbm [shape: f32[2,1200], index: 0, kind: input, shape index: {}]   ;;  %s5826_s1 = inlined_call_operand.hbm [shape: bf16[1200,512], index: 1, kind: input, shape index: {}]   ;;  %s5827_s2 = inlined_call_operand.hbm [shape: f32[1,512], index: 2, kind: input, shape index: {}]   ;;  %s5828_s3 = inlined_call_operand.hbm [shape: bf16[512,512], index: 3, kind: input, shape index: {}]   ;;  %s5829_s4 = inlined_call_operand.hbm [shape: f32[1,512], index: 4, kind: input, shape index: {}]   ;;  %s5830_s5 = inlined_call_operand.hbm [shape: bf16[512,128], index: 5, kind: input, shape index: {}]   ;;  %s5831_s6 = inlined_call_operand.hbm [shape: f32[1,128], index: 6, kind: input, shape index: {}]   ;;  %s5832_s7 = inlined_call_operand.hbm [shape: bf16[2,128], index: 7, kind: output, shape index: {}]  }
   0x1   :  { %13 = vsyncpa [#allocation6], 0 }
   0x2   :  { %14 = vsyncpa [#allocation9], 0 }
   0x3   :  { %15 = vsyncpa [#allocation12], 0 }
   0x4   :  { %16 = vsyncpa [#allocation4], 0 }
   0x5   :  { %21 = vsyncadd [#allocation3], 2240  ;;  %s5554_s24 = smov [#allocation5]   ;;  %s5368_s28 = scalar_lea.hbm %s5826_s1, 38400 }
   0x6   :  { %s34_s25 = sshll.u32 %s5554_s24, 4  ;;  %p5369_p0 = scmp.ne.s32.totalorder %s5826_s1, %s5368_s28  ;;  %s35_s25 = int_to_ptr.vmem [resolvable:$true] %s34_s25 }
   0x7   :  { %p5372_p1 = scmp.lt.u32.totalorder %s5368_s28, %s5826_s1 }
   0x9   :  { %p5374_p2 = pnand %p5372_p1, %p5369_p0 }
   0xb   :  { %5377 = shalt.err (!%p5374_p2)
}
   0xc   :  { %s5378_s10 = scalar_lea.vmem %s35_s25, 38400  ;;  %p5383_p4 = scmp.lt.s32.totalorder %s35_s25, %s35_s25 }
   0xd   :  { %p5379_p3 = scmp.ne.s32.totalorder %s35_s25, %s5378_s10  ;;  %p5384_p5 = scmp.lt.s32.totalorder %s5378_s10, %s5378_s10 }
   0xf   :  { %p5385_p6 = por %p5384_p5, %p5383_p4 }
  0x11   :  { %p5386_p7 = pnand %p5385_p6, %p5379_p3 }
  0x13   :  { %5389 = shalt.err (!%p5386_p7)
}
  0x14   :  { %s5555_s11 = smov 256   ;;  %s5556_s12 = smov 16  }
  0x15   :  { %40 = dma.hbm_to_vmem [thread:$0]  %s5826_s1, 38400, %s35_s25, [#allocation6], %s5555_s11, %s5555_s11, %s5556_s12  }
  0x16   :  { %s5557_s15 = smov [#allocation8]   ;;  %s5558_s17 = smov [#allocation11]  }
  0x17   :  { %s56_s16 = sshll.u32 %s5557_s15, 4  ;;  %s78_s18 = sshll.u32 %s5558_s17, 4  ;;  %s57_s16 = int_to_ptr.vmem [resolvable:$true] %s56_s16  ;;  %s79_s18 = int_to_ptr.vmem [resolvable:$true] %s78_s18 }
  0x18   :  { %s5390_s21 = scalar_lea.hbm %s5828_s3, 16384 }
  0x19   :  { %p5391_p8 = scmp.ne.s32.totalorder %s5828_s3, %s5390_s21  ;;  %p5394_p9 = scmp.lt.u32.totalorder %s5390_s21, %s5828_s3 }
  0x1b   :  { %p5396_p10 = pnand %p5394_p9, %p5391_p8 }
  0x1d   :  { %5399 = shalt.err (!%p5396_p10)
}
  0x1e   :  { %s5400_s1 = scalar_lea.vmem %s57_s16, 16384  ;;  %p5405_p12 = scmp.lt.s32.totalorder %s57_s16, %s57_s16 }
  0x1f   :  { %p5401_p11 = scmp.ne.s32.totalorder %s57_s16, %s5400_s1  ;;  %p5406_p13 = scmp.lt.s32.totalorder %s5400_s1, %s5400_s1 }
  0x21   :  { %p5407_p0 = por %p5406_p13, %p5405_p12 }
  0x23   :  { %p5408_p1 = pnand %p5407_p0, %p5401_p11 }
  0x25   :  { %5411 = shalt.err (!%p5408_p1)
}
  0x26   :  { %62 = dma.hbm_to_vmem [thread:$0]  %s5828_s3, 16384, %s57_s16, [#allocation9], %s5555_s11, %s5555_s11, %s5556_s12  }
  0x27   :  { %s5412_s30 = scalar_lea.hbm %s5830_s5, 4096 }
  0x28   :  { %p5413_p2 = scmp.ne.s32.totalorder %s5830_s5, %s5412_s30  ;;  %p5416_p3 = scmp.lt.u32.totalorder %s5412_s30, %s5830_s5 }
  0x2a   :  { %p5418_p4 = pnand %p5416_p3, %p5413_p2 }
  0x2c   :  { %5421 = shalt.err (!%p5418_p4)
}
  0x2d   :  { %s5422_s14 = scalar_lea.vmem %s79_s18, 4096  ;;  %p5427_p6 = scmp.lt.s32.totalorder %s79_s18, %s79_s18 }
  0x2e   :  { %p5423_p5 = scmp.ne.s32.totalorder %s79_s18, %s5422_s14  ;;  %p5428_p7 = scmp.lt.s32.totalorder %s5422_s14, %s5422_s14 }
  0x30   :  { %p5429_p8 = por %p5428_p7, %p5427_p6 }
  0x32   :  { %p5430_p9 = pnand %p5429_p8, %p5423_p5 }
  0x34   :  { %5433 = shalt.err (!%p5430_p9)
}
  0x35   :  { %s5559_s3 = smov 64   ;;  %s5560_s11 = smov 4  }
  0x36   :  { %84 = dma.hbm_to_vmem [thread:$0]  %s5830_s5, 4096, %s79_s18, [#allocation12], %s5559_s3, %s5559_s3, %s5560_s11  }
  0x37   :  { %s5561_s17 = smov [#allocation2]   ;;  %s5434_s22 = scalar_lea.hbm %s5825_s0, 320 }
  0x38   :  { %s22_s19 = sshll.u32 %s5561_s17, 4  ;;  %p5435_p10 = scmp.ne.s32.totalorder %s5825_s0, %s5434_s22  ;;  %s23_s19 = int_to_ptr.vmem [resolvable:$true] %s22_s19 }
  0x39   :  { %p5438_p11 = scmp.lt.u32.totalorder %s5434_s22, %s5825_s0 }
  0x3b   :  { %p5440_p12 = pnand %p5438_p11, %p5435_p10 }
  0x3d   :  { %5443 = shalt.err (!%p5440_p12)
}
  0x3e   :  { %s5444_s25 = scalar_lea.vmem %s23_s19, 320  ;;  %s5448_s5 = scalar_lea.vmem %s23_s19, 2560 }
  0x3f   :  { %p5445_p13 = scmp.ne.s32.totalorder %s23_s19, %s5444_s25  ;;  %p5449_p0 = scmp.lt.s32.totalorder %s23_s19, %s23_s19 }
  0x40   :  { %p5450_p1 = scmp.lt.s32.totalorder %s5448_s5, %s5444_s25 }
  0x42   :  { %p5451_p2 = por %p5450_p1, %p5449_p0 }
  0x44   :  { %p5452_p3 = pnand %p5451_p2, %p5445_p13 }
  0x46   :  { %5455 = shalt.err (!%p5452_p3)
}
  0x47   :  { %s5562_s18 = smov 320   ;;  %s5563_s27 = smov 20  }
  0x48   :  { %28 = dma.hbm_to_vmem [thread:$0]  %s5825_s0, 320, %s23_s19, [#allocation3], %s5562_s18, %s5562_s18, %s5563_s27  }
  0x49   :  { %s5564_s30 = smov [#allocation7]   ;;  %s5565_s9 = smov [#allocation10]  }
  0x4a   :  { %s47_s8 = sshll.u32 %s5564_s30, 4  ;;  %s69_s10 = sshll.u32 %s5565_s9, 4  ;;  %s48_s8 = int_to_ptr.vmem [resolvable:$true] %s47_s8  ;;  %s70_s10 = int_to_ptr.vmem [resolvable:$true] %s69_s10 }
  0x4b   :  { %s5456_s3 = scalar_lea.hbm %s5827_s2, 64 }
  0x4c   :  { %p5457_p4 = scmp.ne.s32.totalorder %s5827_s2, %s5456_s3  ;;  %p5460_p5 = scmp.lt.u32.totalorder %s5456_s3, %s5827_s2 }
  0x4e   :  { %p5462_p6 = pnand %p5460_p5, %p5457_p4 }
  0x50   :  { %5465 = shalt.err (!%p5462_p6)
}
  0x51   :  { %s5466_s0 = scalar_lea.vmem %s48_s8, 64  ;;  %p5471_p8 = scmp.lt.s32.totalorder %s48_s8, %s48_s8 }
  0x52   :  { %p5467_p7 = scmp.ne.s32.totalorder %s48_s8, %s5466_s0  ;;  %p5472_p9 = scmp.lt.s32.totalorder %s5466_s0, %s5466_s0 }
  0x54   :  { %p5473_p10 = por %p5472_p9, %p5471_p8 }
  0x56   :  { %p5474_p11 = pnand %p5473_p10, %p5467_p7 }
  0x58   :  { %5477 = shalt.err (!%p5474_p11)
}
  0x59   :  { %50 = dma.hbm_to_vmem [thread:$0]  %s5827_s2, 64, %s48_s8, [#allocation6]  }
  0x5a   :  { %s5478_s23 = scalar_lea.hbm %s5829_s4, 64 }
  0x5b   :  { %p5479_p12 = scmp.ne.s32.totalorder %s5829_s4, %s5478_s23  ;;  %p5482_p13 = scmp.lt.u32.totalorder %s5478_s23, %s5829_s4 }
  0x5d   :  { %p5484_p0 = pnand %p5482_p13, %p5479_p12 }
  0x5f   :  { %5487 = shalt.err (!%p5484_p0)
}
  0x60   :  { %s5488_s5 = scalar_lea.vmem %s70_s10, 64  ;;  %p5493_p2 = scmp.lt.s32.totalorder %s70_s10, %s70_s10 }
  0x61   :  { %p5489_p1 = scmp.ne.s32.totalorder %s70_s10, %s5488_s5  ;;  %p5494_p3 = scmp.lt.s32.totalorder %s5488_s5, %s5488_s5 }
  0x63   :  { %p5495_p4 = por %p5494_p3, %p5493_p2 }
  0x65   :  { %p5496_p5 = pnand %p5495_p4, %p5489_p1 }
  0x67   :  { %5499 = shalt.err (!%p5496_p5)
}
  0x68   :  { %72 = dma.hbm_to_vmem [thread:$0]  %s5829_s4, 64, %s70_s10, [#allocation9]  }
  0x69   :  { %s5566_s27 = smov [#allocation13]   ;;  %s5500_s8 = scalar_lea.hbm %s5831_s6, 16 }
  0x6a   :  { %s91_s28 = sshll.u32 %s5566_s27, 4  ;;  %p5501_p6 = scmp.ne.s32.totalorder %s5831_s6, %s5500_s8  ;;  %s92_s28 = int_to_ptr.vmem [resolvable:$true] %s91_s28 }
  0x6b   :  { %p5504_p7 = scmp.lt.u32.totalorder %s5500_s8, %s5831_s6 }
  0x6d   :  { %p5506_p8 = pnand %p5504_p7, %p5501_p6 }
  0x6f   :  { %5509 = shalt.err (!%p5506_p8)
}
  0x70   :  { %s5510_s11 = scalar_lea.vmem %s92_s28, 16  ;;  %s5514_s4 = scalar_lea.vmem %s92_s28, 32 }
  0x71   :  { %p5511_p9 = scmp.ne.s32.totalorder %s92_s28, %s5510_s11  ;;  %p5515_p10 = scmp.lt.s32.totalorder %s92_s28, %s92_s28 }
  0x72   :  { %p5516_p11 = scmp.lt.s32.totalorder %s5514_s4, %s5510_s11 }
  0x74   :  { %p5517_p12 = por %p5516_p11, %p5515_p10 }
  0x76   :  { %p5518_p13 = pnand %p5517_p12, %p5511_p9 }
  0x78   :  { %5521 = shalt.err (!%p5518_p13)
}
  0x79   :  { %94 = dma.hbm_to_vmem [thread:$0]  %s5831_s6, 16, %s92_s28, [#allocation12]  }
  0x7a   :  { %5544 = dma.done.wait [#allocation3], 2560  }
  0x7b   :  { %5545 = vsyncadd [#allocation3], 4294964736 }
  0x7c   :  { %5546 = dma.done.wait [#allocation6], 38464  }
  0x7d   :  { %5547 = vsyncadd [#allocation6], 4294928832 }
  0x7e   :  { %5548 = dma.done.wait [#allocation9], 16448  }
  0x7f   :  { %5549 = vsyncadd [#allocation9], 4294950848 }
  0x80   :  { %5550 = dma.done.wait [#allocation12], 4112  }
  0x81   :  { %5551 = vsyncadd [#allocation12], 4294963184  ;;  %v4634_v0 = vld [vmem:[#allocation5 + $0x4] ss:$16 sps:$4 sm:$0xff]   ;;  %v4636_v1 = vld [vmem:[#allocation5 + $0xc] ss:$16 sps:$4 sm:$0xff]   ;;  %v172_v41 = vlaneseq }
  0x82   :  { %2201 = vmatprep.subr.bf16.mxu0 %v4634_v0  ;;  %v4638_v2 = vld [vmem:[#allocation5] ss:$16 sps:$4 sm:$0xff]   ;;  %v4639_v3 = vld [vmem:[#allocation5 + $0x8] ss:$16 sps:$4 sm:$0xff]   ;;  %2416 = vmatprep.subr.bf16.mxu1 %v4636_v1  ;;  %v4640_v4 = vld [vmem:[#allocation5 + $0x24] ss:$16 sps:$4 sm:$0xff]  }
  0x83   :  { %2202 = vmatpush1.bf16.msra.mxu0 %v4638_v2  ;;  %2417 = vmatpush1.bf16.msra.mxu1 %v4639_v3  ;;  %v4642_v5 = vld [vmem:[#allocation5 + $0x2c] ss:$16 sps:$4 sm:$0xff]   ;;  %v4644_v6 = vld [vmem:[#allocation5 + $0x20] ss:$16 sps:$4 sm:$0xff]   ;;  %v4645_v7 = vld [vmem:[#allocation5 + $0x28] ss:$16 sps:$4 sm:$0xff]  }
  0x84   :  { %2203 = vmatprep.subr.bf16.mxu0 %v4640_v4  ;;  %2418 = vmatprep.subr.bf16.mxu1 %v4642_v5  ;;  %v4646_v8 = vld [vmem:[#allocation5 + $0x44] ss:$16 sps:$4 sm:$0xff]   ;;  %v4648_v9 = vld [vmem:[#allocation5 + $0x4c] ss:$16 sps:$4 sm:$0xff]   ;;  %v4650_v10 = vld [vmem:[#allocation5 + $0x40] ss:$16 sps:$4 sm:$0xff]  }
  0x85   :  { %v4651_v11 = vld [vmem:[#allocation5 + $0x48] ss:$16 sps:$4 sm:$0xff]   ;;  %v4652_v12 = vld [vmem:[#allocation5 + $0x64] ss:$16 sps:$4 sm:$0xff]   ;;  %v4654_v13 = vld [vmem:[#allocation5 + $0x6c] ss:$16 sps:$4 sm:$0xff]  }
  0x86   :  { %v4656_v14 = vld [vmem:[#allocation5 + $0x60] ss:$16 sps:$4 sm:$0xff]   ;;  %v4657_v15 = vld [vmem:[#allocation5 + $0x68] ss:$16 sps:$4 sm:$0xff]   ;;  %v4658_v16 = vld [vmem:[#allocation5 + $0x84] ss:$16 sps:$4 sm:$0xff]  }
  0x87   :  { %2204 = vmatpush1.bf16.msra.mxu0 %v4644_v6  ;;  %2419 = vmatpush1.bf16.msra.mxu1 %v4645_v7  ;;  %v4660_v17 = vld [vmem:[#allocation5 + $0x8c] ss:$16 sps:$4 sm:$0xff]   ;;  %v4662_v18 = vld [vmem:[#allocation5 + $0x80] ss:$16 sps:$4 sm:$0xff]   ;;  %v4663_v19 = vld [vmem:[#allocation5 + $0x88] ss:$16 sps:$4 sm:$0xff]  }
  0x88   :  { %2205 = vmatprep.subr.bf16.mxu0 %v4646_v8  ;;  %2420 = vmatprep.subr.bf16.mxu1 %v4648_v9  ;;  %v4664_v20 = vld [vmem:[#allocation5 + $0xa4] ss:$16 sps:$4 sm:$0xff]   ;;  %v4666_v21 = vld [vmem:[#allocation5 + $0xac] ss:$16 sps:$4 sm:$0xff]   ;;  %v4668_v22 = vld [vmem:[#allocation5 + $0xa0] ss:$16 sps:$4 sm:$0xff]  }
  0x89   :  { %v4669_v23 = vld [vmem:[#allocation5 + $0xa8] ss:$16 sps:$4 sm:$0xff]   ;;  %v4670_v24 = vld [vmem:[#allocation5 + $0xc4] ss:$16 sps:$4 sm:$0xff]   ;;  %v4672_v25 = vld [vmem:[#allocation5 + $0xcc] ss:$16 sps:$4 sm:$0xff]  }
  0x8a   :  { %v4674_v26 = vld [vmem:[#allocation5 + $0xc0] ss:$16 sps:$4 sm:$0xff]   ;;  %v4675_v27 = vld [vmem:[#allocation5 + $0xc8] ss:$16 sps:$4 sm:$0xff]   ;;  %v4676_v28 = vld [vmem:[#allocation5 + $0xe4] ss:$16 sps:$4 sm:$0xff]  }
  0x8b   :  { %2206 = vmatpush1.bf16.msra.mxu0 %v4650_v10  ;;  %2421 = vmatpush1.bf16.msra.mxu1 %v4651_v11  ;;  %v4678_v29 = vld [vmem:[#allocation5 + $0xec] ss:$16 sps:$4 sm:$0xff]   ;;  %v4680_v30 = vld [vmem:[#allocation5 + $0xe0] ss:$16 sps:$4 sm:$0xff]   ;;  %v4681_v31 = vld [vmem:[#allocation5 + $0xe8] ss:$16 sps:$4 sm:$0xff]  }
  0x8c   :  { %2207 = vmatprep.subr.bf16.mxu0 %v4652_v12  ;;  %2422 = vmatprep.subr.bf16.mxu1 %v4654_v13  ;;  %v4682_v32 = vld [vmem:[#allocation5 + $0x104] ss:$16 sps:$4 sm:$0xff]   ;;  %v4684_v33 = vld [vmem:[#allocation5 + $0x10c] ss:$16 sps:$4 sm:$0xff]   ;;  %v4686_v34 = vld [vmem:[#allocation5 + $0x100] ss:$16 sps:$4 sm:$0xff]  }
  0x8d   :  { %v4687_v35 = vld [vmem:[#allocation5 + $0x108] ss:$16 sps:$4 sm:$0xff]   ;;  %v4688_v36 = vld [vmem:[#allocation5 + $0x124] ss:$16 sps:$4 sm:$0xff]   ;;  %v4690_v37 = vld [vmem:[#allocation5 + $0x12c] ss:$16 sps:$4 sm:$0xff]  }
  0x8e   :  { %v4692_v38 = vld [vmem:[#allocation5 + $0x120] ss:$16 sps:$4 sm:$0xff]   ;;  %v5567_v39 = vmov 1983009808   ;;  %v4693_v42 = vld [vmem:[#allocation5 + $0x128] ss:$16 sps:$4 sm:$0xff]  }
  0x8f   :  { %2208 = vmatpush1.bf16.msra.mxu0 %v4656_v14  ;;  %2423 = vmatpush1.bf16.msra.mxu1 %v4657_v15  ;;  %v170_v40 = vunpack.c.l.s4 %v5567_v39  ;;  %v4694_v43 = vld [vmem:[#allocation5 + $0x144] ss:$16 sps:$4 sm:$0xff]   ;;  %v4696_v44 = vld [vmem:[#allocation5 + $0x14c] ss:$16 sps:$4 sm:$0xff]   ;;  %v4698_v45 = vld [vmem:[#allocation5 + $0x140] ss:$16 sps:$4 sm:$0xff]  }
  0x90   :  { %2209 = vmatprep.subr.bf16.mxu0 %v4658_v16  ;;  %2424 = vmatprep.subr.bf16.mxu1 %v4660_v17  ;;  %v4699_v46 = vld [vmem:[#allocation5 + $0x148] ss:$16 sps:$4 sm:$0xff]   ;;  %v5697_v48 = vshrl.u32 %v172_v41, 7  ;;  %v4700_v49 = vld [vmem:[#allocation5 + $0x164] ss:$16 sps:$4 sm:$0xff]   ;;  %vm2197_vm0 = vcmask 392192  }
  0x91   :  { %v171_v47 = vunpack.c.0.s8 %v170_v40  ;;  %v4702_v50 = vld [vmem:[#allocation5 + $0x16c] ss:$16 sps:$4 sm:$0xff]   ;;  %v4704_v51 = vld [vmem:[#allocation5 + $0x160] ss:$16 sps:$4 sm:$0xff]   ;;  %v4705_v52 = vld [vmem:[#allocation5 + $0x168] ss:$16 sps:$4 sm:$0xff]  }
  0x92   :  { %v4706_v53 = vld [vmem:[#allocation5 + $0x184] ss:$16 sps:$4 sm:$0xff]   ;;  %v4708_v55 = vld [vmem:[#allocation5 + $0x18c] ss:$16 sps:$4 sm:$0xff]   ;;  %v4710_v59 = vld [vmem:[#allocation5 + $0x180] ss:$16 sps:$4 sm:$0xff]  }
  0x93   :  { %2210 = vmatpush1.bf16.msra.mxu0 %v4662_v18  ;;  %2425 = vmatpush1.bf16.msra.mxu1 %v4663_v19  ;;  %v5700_v54 = vsub.s32 %v171_v47, %v5697_v48  ;;  %v4730_v56 = vld [vmem:[#allocation2] ss:$20 sps:$4 sm:$0xff]   ;;  %v4733_v57 = vld [vmem:[#allocation2 + $0x28] ss:$20 sps:$4 sm:$0xff]   ;;  %v4736_v58 = vld [vmem:[#allocation2 + $0x50] ss:$20 sps:$4 sm:$0xff]  }
  0x94   :  { %2211 = vmatprep.subr.bf16.mxu0 %v4664_v20  ;;  %2426 = vmatprep.subr.bf16.mxu1 %v4666_v21  ;;  %v4711_v60 = vld [vmem:[#allocation5 + $0x188] ss:$16 sps:$4 sm:$0xff]   ;;  %v4712_v63 = vld [vmem:[#allocation5 + $0x1a4] ss:$16 sps:$4 sm:$0xff]   ;;  %v4714_v2 = vld [vmem:[#allocation5 + $0x1ac] ss:$16 sps:$4 sm:$0xff]  }
  0x95   :  { %v175_v61 = vrot.slane %v4730_v56, %v5700_v54  ;;  %v4739_v62 = vld [vmem:[#allocation2 + $0x78] ss:$20 sps:$4 sm:$0xff]   ;;  %v189_v0 = vrot.slane %v4733_v57, %v5700_v54  ;;  %v265_v1 = vrot.slane %v4736_v58, %v5700_v54  ;;  %v4716_v4 = vld [vmem:[#allocation5 + $0x1a0] ss:$16 sps:$4 sm:$0xff]   ;;  %v4718_v7 = vld [vmem:[#allocation5 + $0x1c4] ss:$16 sps:$4 sm:$0xff]  }
  0x96   :  { %v279_v3 = vrot.slane %v4739_v62, %v5700_v54  ;;  %v4717_v5 = vld [vmem:[#allocation5 + $0x1a8] ss:$16 sps:$4 sm:$0xff]   ;;  %v4720_v8 = vld [vmem:[#allocation5 + $0x1cc] ss:$16 sps:$4 sm:$0xff]   ;;  %v4722_v15 = vld [vmem:[#allocation5 + $0x1c0] ss:$16 sps:$4 sm:$0xff]  }
  0x97   :  { %2212 = vmatpush1.bf16.msra.mxu0 %v4668_v22  ;;  %2427 = vmatpush1.bf16.msra.mxu1 %v4669_v23  ;;  %v198_v6 = vcombine.high %v175_v61, %v189_v0  ;;  %v4732_v10 = vld [vmem:[#allocation2 + $0x4] ss:$20 sps:$4 sm:$0xff]   ;;  %v4735_v11 = vld [vmem:[#allocation2 + $0x2c] ss:$20 sps:$4 sm:$0xff]   ;;  %v4738_v13 = vld [vmem:[#allocation2 + $0x54] ss:$20 sps:$4 sm:$0xff]  }
  0x98   :  { %2213 = vmatprep.subr.bf16.mxu0 %v4670_v24  ;;  %2428 = vmatprep.subr.bf16.mxu1 %v4672_v25  ;;  %v288_v9 = vcombine.high %v265_v1, %v279_v3  ;;  %v4741_v14 = vld [vmem:[#allocation2 + $0x7c] ss:$20 sps:$4 sm:$0xff]   ;;  %v4723_v16 = vld [vmem:[#allocation5 + $0x1c8] ss:$16 sps:$4 sm:$0xff]   ;;  %v4724_v17 = vld [vmem:[#allocation5 + $0x1e4] ss:$16 sps:$4 sm:$0xff]   ;;  %v5707_v19 = vrot.slane %v4732_v10, %v5700_v54  ;;  %v5710_v20 = vrot.slane %v4735_v11, %v5700_v54 }
  0x99   :  { %v4726_v18 = vld [vmem:[#allocation5 + $0x1ec] ss:$16 sps:$4 sm:$0xff]   ;;  %v5713_v21 = vrot.slane %v4738_v13, %v5700_v54  ;;  %v5716_v22 = vrot.slane %v4741_v14, %v5700_v54  ;;  %v4728_v23 = vld [vmem:[#allocation5 + $0x1e0] ss:$16 sps:$4 sm:$0xff]   ;;  %v4729_v24 = vld [vmem:[#allocation5 + $0x1e8] ss:$16 sps:$4 sm:$0xff]   ;;  %v197_v25 = vcombine.low %v175_v61, %v189_v0 }
  0x9a   :  { %v366_v12 = vpack.c.bf16 %v288_v9, %v198_v6  ;;  %v4756_v39 = vld [vmem:[#allocation5 + $0x244] ss:$16 sps:$4 sm:$0xff]   ;;  %v4759_v40 = vld [vmem:[#allocation5 + $0x24c] ss:$16 sps:$4 sm:$0xff]   ;;  %v4754_v41 = vld [vmem:[#allocation5 + $0x240] ss:$16 sps:$4 sm:$0xff]  }
  0x9b   :  { %2214 = vmatpush1.bf16.msra.mxu0 %v4674_v26  ;;  %2429 = vmatpush1.bf16.msra.mxu1 %v4675_v27  ;;  %v287_v26 = vcombine.low %v265_v1, %v279_v3  ;;  %v4744_v27 = vld [vmem:[#allocation5 + $0x204] ss:$16 sps:$4 sm:$0xff]   ;;  %v4775_v56 = vld [vmem:[#allocation5 + $0x2a8] ss:$16 sps:$4 sm:$0xff]   ;;  %v4783_v58 = vld [vmem:[#allocation5 + $0x2cc] ss:$16 sps:$4 sm:$0xff]  }
  0x9c   :  { %2215 = vmatprep.subr.bf16.mxu0 %v4676_v28  ;;  %2430 = vmatprep.subr.bf16.mxu1 %v4678_v29  ;;  %v4747_v28 = vld [vmem:[#allocation5 + $0x20c] ss:$16 sps:$4 sm:$0xff]   ;;  %v200_v29 = vcombine.high %v5707_v19, %v5710_v20  ;;  %v4768_v47 = vld [vmem:[#allocation5 + $0x284] ss:$16 sps:$4 sm:$0xff]   ;;  %v4787_v0 = vld [vmem:[#allocation5 + $0x2e8] ss:$16 sps:$4 sm:$0xff]  }
  0x9d   :  { %2233 = vmatprep.mubr.bf16.mxu0 %v366_v12  ;;  %2448 = vmatprep.mubr.bf16.mxu1 %v366_v12  ;;  %v4780_v57 = vld [vmem:[#allocation5 + $0x2c4] ss:$16 sps:$4 sm:$0xff]   ;;  %v4789_v62 = vld [vmem:[#allocation5 + $0x2ec] ss:$16 sps:$4 sm:$0xff]   ;;  %v4790_v3 = vld [vmem:[#allocation5 + $0x300] ss:$16 sps:$4 sm:$0xff]  }
  0x9e   :  { %v4786_v61 = vld [vmem:[#allocation5 + $0x2e4] ss:$16 sps:$4 sm:$0xff]   ;;  %v4801_v6 = vld [vmem:[#allocation5 + $0x32c] ss:$16 sps:$4 sm:$0xff]   ;;  %v4802_v11 = vld [vmem:[#allocation5 + $0x340] ss:$16 sps:$4 sm:$0xff]  }
  0x9f   :  { %2216 = vmatpush1.bf16.msra.mxu0 %v4680_v30  ;;  %2431 = vmatpush1.bf16.msra.mxu1 %v4681_v31  ;;  %v290_v30 = vcombine.high %v5713_v21, %v5716_v22  ;;  %v4742_v31 = vld [vmem:[#allocation5 + $0x200] ss:$16 sps:$4 sm:$0xff]   ;;  %v4792_v1 = vld [vmem:[#allocation5 + $0x304] ss:$16 sps:$4 sm:$0xff]   ;;  %v4807_v10 = vld [vmem:[#allocation5 + $0x34c] ss:$16 sps:$4 sm:$0xff]  }
  0xa0   :  { %2217 = vmatprep.subr.bf16.mxu0 %v4682_v32  ;;  %2432 = vmatprep.subr.bf16.mxu1 %v4684_v33  ;;  %v4745_v32 = vld [vmem:[#allocation5 + $0x208] ss:$16 sps:$4 sm:$0xff]   ;;  %v365_v33 = vpack.c.bf16 %v287_v26, %v197_v25  ;;  %v4804_v9 = vld [vmem:[#allocation5 + $0x344] ss:$16 sps:$4 sm:$0xff]   ;;  %v4813_v14 = vld [vmem:[#allocation5 + $0x36c] ss:$16 sps:$4 sm:$0xff]  }
  0xa1   :  { %v4805_v12 = vld [vmem:[#allocation5 + $0x348] ss:$16 sps:$4 sm:$0xff]   ;;  %v4810_v13 = vld [vmem:[#allocation5 + $0x364] ss:$16 sps:$4 sm:$0xff]   ;;  %v4825_v26 = vld [vmem:[#allocation5 + $0x3ac] ss:$16 sps:$4 sm:$0xff]  }
  0xa2   :  { %v4822_v25 = vld [vmem:[#allocation5 + $0x3a4] ss:$16 sps:$4 sm:$0xff]  }
  0xa3   :  { %2218 = vmatpush1.bf16.msra.mxu0 %v4686_v34  ;;  %2433 = vmatpush1.bf16.msra.mxu1 %v4687_v35  ;;  %v4750_v34 = vld [vmem:[#allocation5 + $0x224] ss:$16 sps:$4 sm:$0xff]   ;;  %v4753_v35 = vld [vmem:[#allocation5 + $0x22c] ss:$16 sps:$4 sm:$0xff]  }
  0xa4   :  { %2219 = vmatprep.subr.bf16.mxu0 %v4688_v36  ;;  %2434 = vmatprep.subr.bf16.mxu1 %v4690_v37  ;;  %v368_v36 = vpack.c.bf16 %v290_v30, %v200_v29  ;;  %v4748_v37 = vld [vmem:[#allocation5 + $0x220] ss:$16 sps:$4 sm:$0xff]   ;;  %v4828_v29 = vld [vmem:[#allocation5 + $0x3c4] ss:$16 sps:$4 sm:$0xff]   ;;  %v4831_v30 = vld [vmem:[#allocation5 + $0x3cc] ss:$16 sps:$4 sm:$0xff]  }
  0xa7   :  { %2220 = vmatpush1.bf16.msra.mxu0 %v4692_v38  ;;  %2435 = vmatpush1.bf16.msra.mxu1 %v4693_v42  ;;  %v4751_v38 = vld [vmem:[#allocation5 + $0x228] ss:$16 sps:$4 sm:$0xff]  }
  0xa8   :  { %2221 = vmatprep.subr.bf16.mxu0 %v4694_v43  ;;  %2436 = vmatprep.subr.bf16.mxu1 %v4696_v44  ;;  %v4757_v42 = vld [vmem:[#allocation5 + $0x248] ss:$16 sps:$4 sm:$0xff]   ;;  %v4762_v43 = vld [vmem:[#allocation5 + $0x264] ss:$16 sps:$4 sm:$0xff]   ;;  %v4765_v44 = vld [vmem:[#allocation5 + $0x26c] ss:$16 sps:$4 sm:$0xff]  }
  0xab   :  { %2222 = vmatpush1.bf16.msra.mxu0 %v4698_v45  ;;  %2437 = vmatpush1.bf16.msra.mxu1 %v4699_v46  ;;  %v4760_v45 = vld [vmem:[#allocation5 + $0x260] ss:$16 sps:$4 sm:$0xff]   ;;  %v4763_v46 = vld [vmem:[#allocation5 + $0x268] ss:$16 sps:$4 sm:$0xff]  }
  0xac   :  { %2223 = vmatprep.subr.bf16.mxu0 %v4700_v49  ;;  %2438 = vmatprep.subr.bf16.mxu1 %v4702_v50  ;;  %v4771_v49 = vld [vmem:[#allocation5 + $0x28c] ss:$16 sps:$4 sm:$0xff]   ;;  %v4766_v50 = vld [vmem:[#allocation5 + $0x280] ss:$16 sps:$4 sm:$0xff]  }
  0xaf   :  { %2224 = vmatpush1.bf16.msra.mxu0 %v4704_v51  ;;  %2439 = vmatpush1.bf16.msra.mxu1 %v4705_v52  ;;  %v4769_v51 = vld [vmem:[#allocation5 + $0x288] ss:$16 sps:$4 sm:$0xff]   ;;  %v4774_v52 = vld [vmem:[#allocation5 + $0x2a4] ss:$16 sps:$4 sm:$0xff]  }
  0xb0   :  { %2225 = vmatprep.subr.bf16.mxu0 %v4706_v53  ;;  %2440 = vmatprep.subr.bf16.mxu1 %v4708_v55  ;;  %v4777_v53 = vld [vmem:[#allocation5 + $0x2ac] ss:$16 sps:$4 sm:$0xff]   ;;  %v4772_v55 = vld [vmem:[#allocation5 + $0x2a0] ss:$16 sps:$4 sm:$0xff]  }
  0xb3   :  { %2226 = vmatpush1.bf16.msra.mxu0 %v4710_v59  ;;  %2441 = vmatpush1.bf16.msra.mxu1 %v4711_v60  ;;  %v4778_v59 = vld [vmem:[#allocation5 + $0x2c0] ss:$16 sps:$4 sm:$0xff]   ;;  %v4781_v60 = vld [vmem:[#allocation5 + $0x2c8] ss:$16 sps:$4 sm:$0xff]  }
  0xb4   :  { %2227 = vmatprep.subr.bf16.mxu0 %v4712_v63  ;;  %2442 = vmatprep.subr.bf16.mxu1 %v4714_v2  ;;  %v4784_v63 = vld [vmem:[#allocation5 + $0x2e0] ss:$16 sps:$4 sm:$0xff]   ;;  %v4795_v2 = vld [vmem:[#allocation5 + $0x30c] ss:$16 sps:$4 sm:$0xff]  }
  0xb7   :  { %2228 = vmatpush1.bf16.msra.mxu0 %v4716_v4  ;;  %2443 = vmatpush1.bf16.msra.mxu1 %v4717_v5  ;;  %v4793_v4 = vld [vmem:[#allocation5 + $0x308] ss:$16 sps:$4 sm:$0xff]   ;;  %v4798_v5 = vld [vmem:[#allocation5 + $0x324] ss:$16 sps:$4 sm:$0xff]  }
  0xb8   :  { %2229 = vmatprep.subr.bf16.mxu0 %v4718_v7  ;;  %2444 = vmatprep.subr.bf16.mxu1 %v4720_v8  ;;  %v4796_v7 = vld [vmem:[#allocation5 + $0x320] ss:$16 sps:$4 sm:$0xff]   ;;  %v4799_v8 = vld [vmem:[#allocation5 + $0x328] ss:$16 sps:$4 sm:$0xff]  }
  0xbb   :  { %2230 = vmatpush1.bf16.msra.mxu0 %v4722_v15  ;;  %2445 = vmatpush1.bf16.msra.mxu1 %v4723_v16  ;;  %v4808_v15 = vld [vmem:[#allocation5 + $0x360] ss:$16 sps:$4 sm:$0xff]   ;;  %v4811_v16 = vld [vmem:[#allocation5 + $0x368] ss:$16 sps:$4 sm:$0xff]  }
  0xbc   :  { %2231 = vmatprep.subr.bf16.mxu0 %v4724_v17  ;;  %2446 = vmatprep.subr.bf16.mxu1 %v4726_v18  ;;  %v4816_v17 = vld [vmem:[#allocation5 + $0x384] ss:$16 sps:$4 sm:$0xff]   ;;  %v4819_v18 = vld [vmem:[#allocation5 + $0x38c] ss:$16 sps:$4 sm:$0xff]  }
  0xbf   :  { %2232 = vmatpush1.bf16.msra.mxu0 %v4728_v23  ;;  %2447 = vmatpush1.bf16.msra.mxu1 %v4729_v24  ;;  %v4814_v23 = vld [vmem:[#allocation5 + $0x380] ss:$16 sps:$4 sm:$0xff]   ;;  %v4817_v24 = vld [vmem:[#allocation5 + $0x388] ss:$16 sps:$4 sm:$0xff]  }
  0xc0   :  { %2244 = vmatprep.subr.bf16.mxu0 %v4744_v27  ;;  %2459 = vmatprep.subr.bf16.mxu1 %v4747_v28  ;;  %v4820_v27 = vld [vmem:[#allocation5 + $0x3a0] ss:$16 sps:$4 sm:$0xff]   ;;  %v4823_v28 = vld [vmem:[#allocation5 + $0x3a8] ss:$16 sps:$4 sm:$0xff]  }
  0xc2   :  { %2234 = vmatmul.mubr.bf16.vlgmr.msra.gmra.mrb[0].mxu0 %v365_v33  ;;  %2449 = vmatmul.mubr.bf16.vlgmr.msra.gmra.mrb[0].mxu1 %v365_v33  ;;  %v4834_v33 = vld [vmem:[#allocation5 + $0x3e4] ss:$16 sps:$4 sm:$0xff]  }
  0xc3   :  { %2245 = vmatpush1.bf16.msra.mxu0 %v4742_v31  ;;  %2460 = vmatpush1.bf16.msra.mxu1 %v4745_v32  ;;  %v4826_v31 = vld [vmem:[#allocation5 + $0x3c0] ss:$16 sps:$4 sm:$0xff]   ;;  %v4829_v32 = vld [vmem:[#allocation5 + $0x3c8] ss:$16 sps:$4 sm:$0xff]  }
  0xc4   :  { %2246 = vmatprep.subr.bf16.mxu0 %v4750_v34  ;;  %2461 = vmatprep.subr.bf16.mxu1 %v4753_v35  ;;  %v4837_v34 = vld [vmem:[#allocation5 + $0x3ec] ss:$16 sps:$4 sm:$0xff]   ;;  %v4832_v35 = vld [vmem:[#allocation5 + $0x3e0] ss:$16 sps:$4 sm:$0xff]  }
  0xc5   :  { %2276 = vmatprep.mubr.bf16.mxu0 %v368_v36  ;;  %2491 = vmatprep.mubr.bf16.mxu1 %v368_v36  ;;  %v4835_v36 = vld [vmem:[#allocation5 + $0x3e8] ss:$16 sps:$4 sm:$0xff]  }
  0xc7   :  { %2247 = vmatpush1.bf16.msra.mxu0 %v4748_v37  ;;  %2462 = vmatpush1.bf16.msra.mxu1 %v4751_v38  ;;  %v199_v37 = vcombine.low %v5707_v19, %v5710_v20  ;;  %v289_v38 = vcombine.low %v5713_v21, %v5716_v22  ;;  %v4844_v19 = vld [vmem:[#allocation5 + $0x420] ss:$16 sps:$4 sm:$0xff]   ;;  %v4847_v20 = vld [vmem:[#allocation5 + $0x428] ss:$16 sps:$4 sm:$0xff]   ;;  %v4852_v21 = vld [vmem:[#allocation5 + $0x444] ss:$16 sps:$4 sm:$0xff]  }
  0xc8   :  { %2248 = vmatprep.subr.bf16.mxu0 %v4756_v39  ;;  %2463 = vmatprep.subr.bf16.mxu1 %v4759_v40  ;;  %v4840_v39 = vld [vmem:[#allocation5 + $0x404] ss:$16 sps:$4 sm:$0xff]   ;;  %v4843_v40 = vld [vmem:[#allocation5 + $0x40c] ss:$16 sps:$4 sm:$0xff]  }
  0xc9   :  { %v4855_v22 = vld [vmem:[#allocation5 + $0x44c] ss:$16 sps:$4 sm:$0xff]  }
  0xcb   :  { %2249 = vmatpush1.bf16.msra.mxu0 %v4754_v41  ;;  %2464 = vmatpush1.bf16.msra.mxu1 %v4757_v42  ;;  %v4838_v41 = vld [vmem:[#allocation5 + $0x400] ss:$16 sps:$4 sm:$0xff]   ;;  %v4841_v42 = vld [vmem:[#allocation5 + $0x408] ss:$16 sps:$4 sm:$0xff]  }
  0xcc   :  { %2250 = vmatprep.subr.bf16.mxu0 %v4762_v43  ;;  %2465 = vmatprep.subr.bf16.mxu1 %v4765_v44  ;;  %v367_v43 = vpack.c.bf16 %v289_v38, %v199_v37  ;;  %v4846_v44 = vld [vmem:[#allocation5 + $0x424] ss:$16 sps:$4 sm:$0xff]   ;;  %v4915_v38 = vld [vmem:[#allocation5 + $0x58c] ss:$16 sps:$4 sm:$0xff]  }
  0xcd   :  { %v4912_v37 = vld [vmem:[#allocation5 + $0x584] ss:$16 sps:$4 sm:$0xff]  }
  0xcf   :  { %2251 = vmatpush1.bf16.msra.mxu0 %v4760_v45  ;;  %2466 = vmatpush1.bf16.msra.mxu1 %v4763_v46  ;;  %v4849_v45 = vld [vmem:[#allocation5 + $0x42c] ss:$16 sps:$4 sm:$0xff]   ;;  %v4850_v46 = vld [vmem:[#allocation5 + $0x440] ss:$16 sps:$4 sm:$0xff]  }
  0xd0   :  { %2252 = vmatprep.subr.bf16.mxu0 %v4768_v47  ;;  %2467 = vmatprep.subr.bf16.mxu1 %v4771_v49  ;;  %v4853_v47 = vld [vmem:[#allocation5 + $0x448] ss:$16 sps:$4 sm:$0xff]   ;;  %v4858_v49 = vld [vmem:[#allocation5 + $0x464] ss:$16 sps:$4 sm:$0xff]  }
  0xd3   :  { %2253 = vmatpush1.bf16.msra.mxu0 %v4766_v50  ;;  %2468 = vmatpush1.bf16.msra.mxu1 %v4769_v51  ;;  %v4861_v50 = vld [vmem:[#allocation5 + $0x46c] ss:$16 sps:$4 sm:$0xff]  }
  0xd4   :  { %2254 = vmatprep.subr.bf16.mxu0 %v4774_v52  ;;  %2469 = vmatprep.subr.bf16.mxu1 %v4777_v53  ;;  %v4934_v51 = vld [vmem:[#allocation2 + $0x8] ss:$20 sps:$4 sm:$0xff]   ;;  %v4936_v52 = vld [vmem:[#allocation2 + $0x30] ss:$20 sps:$4 sm:$0xff]   ;;  %v4938_v53 = vld [vmem:[#allocation2 + $0x58] ss:$20 sps:$4 sm:$0xff]  }
  0xd7   :  { %2255 = vmatpush1.bf16.msra.mxu0 %v4772_v55  ;;  %2470 = vmatpush1.bf16.msra.mxu1 %v4775_v56  ;;  %v4940_v55 = vld [vmem:[#allocation2 + $0x80] ss:$20 sps:$4 sm:$0xff]   ;;  %v5727_v56 = vrot.slane %v4934_v51, %v5700_v54  ;;  %v4933_v51 = vld [vmem:[#allocation5 + $0x5ec] ss:$16 sps:$4 sm:$0xff]  }
  0xd8   :  { %2256 = vmatprep.subr.bf16.mxu0 %v4780_v57  ;;  %2471 = vmatprep.subr.bf16.mxu1 %v4783_v58  ;;  %v5730_v57 = vrot.slane %v4936_v52, %v5700_v54  ;;  %v5733_v58 = vrot.slane %v4938_v53, %v5700_v54 }
  0xdb   :  { %2257 = vmatpush1.bf16.msra.mxu0 %v4778_v59  ;;  %2472 = vmatpush1.bf16.msra.mxu1 %v4781_v60  ;;  %v4856_v59 = vld [vmem:[#allocation5 + $0x460] ss:$16 sps:$4 sm:$0xff]   ;;  %v4859_v60 = vld [vmem:[#allocation5 + $0x468] ss:$16 sps:$4 sm:$0xff]  }
  0xdc   :  { %2258 = vmatprep.subr.bf16.mxu0 %v4786_v61  ;;  %2473 = vmatprep.subr.bf16.mxu1 %v4789_v62  ;;  %v5736_v61 = vrot.slane %v4940_v55, %v5700_v54  ;;  %v4864_v62 = vld [vmem:[#allocation5 + $0x484] ss:$16 sps:$4 sm:$0xff]  }
  0xdf   :  { %2259 = vmatpush1.bf16.msra.mxu0 %v4784_v63  ;;  %2474 = vmatpush1.bf16.msra.mxu1 %v4787_v0  ;;  %v234_v63 = vcombine.high %v5727_v56, %v5730_v57  ;;  %v4867_v0 = vld [vmem:[#allocation5 + $0x48c] ss:$16 sps:$4 sm:$0xff]  }
  0xe0   :  { %2260 = vmatprep.subr.bf16.mxu0 %v4792_v1  ;;  %2475 = vmatprep.subr.bf16.mxu1 %v4795_v2  ;;  %v324_v1 = vcombine.high %v5733_v58, %v5736_v61  ;;  %v4862_v2 = vld [vmem:[#allocation5 + $0x480] ss:$16 sps:$4 sm:$0xff]  }
  0xe3   :  { %2261 = vmatpush1.bf16.msra.mxu0 %v4790_v3  ;;  %2476 = vmatpush1.bf16.msra.mxu1 %v4793_v4  ;;  %v4865_v3 = vld [vmem:[#allocation5 + $0x488] ss:$16 sps:$4 sm:$0xff]   ;;  %v370_v4 = vpack.c.bf16 %v324_v1, %v234_v63  ;;  %v233_v63 = vcombine.low %v5727_v56, %v5730_v57  ;;  %v4944_v1 = vld [vmem:[#allocation5 + $0x604] ss:$16 sps:$4 sm:$0xff]   ;;  %v4953_v57 = vld [vmem:[#allocation5 + $0x62c] ss:$16 sps:$4 sm:$0xff]  }
  0xe4   :  { %2262 = vmatprep.subr.bf16.mxu0 %v4798_v5  ;;  %2477 = vmatprep.subr.bf16.mxu1 %v4801_v6  ;;  %v4870_v5 = vld [vmem:[#allocation5 + $0x4a4] ss:$16 sps:$4 sm:$0xff]   ;;  %v4873_v6 = vld [vmem:[#allocation5 + $0x4ac] ss:$16 sps:$4 sm:$0xff]  }
  0xe5   :  { %v4950_v56 = vld [vmem:[#allocation5 + $0x624] ss:$16 sps:$4 sm:$0xff]  }
  0xe7   :  { %2263 = vmatpush1.bf16.msra.mxu0 %v4796_v7  ;;  %2478 = vmatpush1.bf16.msra.mxu1 %v4799_v8  ;;  %v4868_v7 = vld [vmem:[#allocation5 + $0x4a0] ss:$16 sps:$4 sm:$0xff]   ;;  %v4871_v8 = vld [vmem:[#allocation5 + $0x4a8] ss:$16 sps:$4 sm:$0xff]  }
  0xe8   :  { %2264 = vmatprep.subr.bf16.mxu0 %v4804_v9  ;;  %2479 = vmatprep.subr.bf16.mxu1 %v4807_v10  ;;  %v4876_v9 = vld [vmem:[#allocation5 + $0x4c4] ss:$16 sps:$4 sm:$0xff]   ;;  %v4879_v10 = vld [vmem:[#allocation5 + $0x4cc] ss:$16 sps:$4 sm:$0xff]  }
  0xeb   :  { %2265 = vmatpush1.bf16.msra.mxu0 %v4802_v11  ;;  %2480 = vmatpush1.bf16.msra.mxu1 %v4805_v12  ;;  %v4874_v11 = vld [vmem:[#allocation5 + $0x4c0] ss:$16 sps:$4 sm:$0xff]   ;;  %v4877_v12 = vld [vmem:[#allocation5 + $0x4c8] ss:$16 sps:$4 sm:$0xff]  }
  0xec   :  { %2266 = vmatprep.subr.bf16.mxu0 %v4810_v13  ;;  %2481 = vmatprep.subr.bf16.mxu1 %v4813_v14  ;;  %v4882_v13 = vld [vmem:[#allocation5 + $0x4e4] ss:$16 sps:$4 sm:$0xff]   ;;  %v4885_v14 = vld [vmem:[#allocation5 + $0x4ec] ss:$16 sps:$4 sm:$0xff]  }
  0xef   :  { %2267 = vmatpush1.bf16.msra.mxu0 %v4808_v15  ;;  %2482 = vmatpush1.bf16.msra.mxu1 %v4811_v16  ;;  %v4880_v15 = vld [vmem:[#allocation5 + $0x4e0] ss:$16 sps:$4 sm:$0xff]   ;;  %v4883_v16 = vld [vmem:[#allocation5 + $0x4e8] ss:$16 sps:$4 sm:$0xff]  }
  0xf0   :  { %2268 = vmatprep.subr.bf16.mxu0 %v4816_v17  ;;  %2483 = vmatprep.subr.bf16.mxu1 %v4819_v18  ;;  %v4888_v17 = vld [vmem:[#allocation5 + $0x504] ss:$16 sps:$4 sm:$0xff]   ;;  %v4891_v18 = vld [vmem:[#allocation5 + $0x50c] ss:$16 sps:$4 sm:$0xff]  }
  0xf3   :  { %2269 = vmatpush1.bf16.msra.mxu0 %v4814_v23  ;;  %2484 = vmatpush1.bf16.msra.mxu1 %v4817_v24  ;;  %v4886_v23 = vld [vmem:[#allocation5 + $0x500] ss:$16 sps:$4 sm:$0xff]   ;;  %v4889_v24 = vld [vmem:[#allocation5 + $0x508] ss:$16 sps:$4 sm:$0xff]  }
  0xf4   :  { %2270 = vmatprep.subr.bf16.mxu0 %v4822_v25  ;;  %2485 = vmatprep.subr.bf16.mxu1 %v4825_v26  ;;  %v4894_v25 = vld [vmem:[#allocation5 + $0x524] ss:$16 sps:$4 sm:$0xff]   ;;  %v4897_v26 = vld [vmem:[#allocation5 + $0x52c] ss:$16 sps:$4 sm:$0xff]  }
  0xf7   :  { %2271 = vmatpush1.bf16.msra.mxu0 %v4820_v27  ;;  %2486 = vmatpush1.bf16.msra.mxu1 %v4823_v28  ;;  %v4892_v27 = vld [vmem:[#allocation5 + $0x520] ss:$16 sps:$4 sm:$0xff]   ;;  %v4895_v28 = vld [vmem:[#allocation5 + $0x528] ss:$16 sps:$4 sm:$0xff]  }
  0xf8   :  { %2272 = vmatprep.subr.bf16.mxu0 %v4828_v29  ;;  %2487 = vmatprep.subr.bf16.mxu1 %v4831_v30  ;;  %v4900_v29 = vld [vmem:[#allocation5 + $0x544] ss:$16 sps:$4 sm:$0xff]   ;;  %v4903_v30 = vld [vmem:[#allocation5 + $0x54c] ss:$16 sps:$4 sm:$0xff]  }
  0xfb   :  { %2273 = vmatpush1.bf16.msra.mxu0 %v4826_v31  ;;  %2488 = vmatpush1.bf16.msra.mxu1 %v4829_v32  ;;  %v4898_v31 = vld [vmem:[#allocation5 + $0x540] ss:$16 sps:$4 sm:$0xff]   ;;  %v4901_v32 = vld [vmem:[#allocation5 + $0x548] ss:$16 sps:$4 sm:$0xff]  }
  0xfc   :  { %2274 = vmatprep.subr.bf16.mxu0 %v4834_v33  ;;  %2489 = vmatprep.subr.bf16.mxu1 %v4837_v34  ;;  %v4906_v33 = vld [vmem:[#allocation5 + $0x564] ss:$16 sps:$4 sm:$0xff]   ;;  %v4909_v34 = vld [vmem:[#allocation5 + $0x56c] ss:$16 sps:$4 sm:$0xff]  }
  0xff   :  { %2275 = vmatpush1.bf16.msra.mxu0 %v4832_v35  ;;  %2490 = vmatpush1.bf16.msra.mxu1 %v4835_v36  ;;  %v4904_v35 = vld [vmem:[#allocation5 + $0x560] ss:$16 sps:$4 sm:$0xff]   ;;  %v4907_v36 = vld [vmem:[#allocation5 + $0x568] ss:$16 sps:$4 sm:$0xff]  }
 0x100   :  { %2287 = vmatprep.subr.bf16.mxu0 %v4840_v39  ;;  %2502 = vmatprep.subr.bf16.mxu1 %v4843_v40  ;;  %v4910_v39 = vld [vmem:[#allocation5 + $0x580] ss:$16 sps:$4 sm:$0xff]   ;;  %v4913_v40 = vld [vmem:[#allocation5 + $0x588] ss:$16 sps:$4 sm:$0xff]  }
 0x102   :  { %2277 = vmatmul.mubr.bf16.vlgmr.msra.gmra.mrb[0].mxu0 %v367_v43  ;;  %2492 = vmatmul.mubr.bf16.vlgmr.msra.gmra.mrb[0].mxu1 %v367_v43  ;;  %v4916_v43 = vld [vmem:[#allocation5 + $0x5a0] ss:$16 sps:$4 sm:$0xff]  }
 0x103   :  { %2288 = vmatpush1.bf16.msra.mxu0 %v4838_v41  ;;  %2503 = vmatpush1.bf16.msra.mxu1 %v4841_v42  ;;  %v4918_v41 = vld [vmem:[#allocation5 + $0x5a4] ss:$16 sps:$4 sm:$0xff]   ;;  %v4921_v42 = vld [vmem:[#allocation5 + $0x5ac] ss:$16 sps:$4 sm:$0xff]  }
 0x104   :  { %2289 = vmatprep.subr.bf16.mxu0 %v4846_v44  ;;  %2504 = vmatprep.subr.bf16.mxu1 %v4849_v45  ;;  %v4919_v44 = vld [vmem:[#allocation5 + $0x5a8] ss:$16 sps:$4 sm:$0xff]   ;;  %v4924_v45 = vld [vmem:[#allocation5 + $0x5c4] ss:$16 sps:$4 sm:$0xff]  }
 0x105   :  { %2319 = vmatprep.mubr.bf16.mxu0 %v370_v4  ;;  %2534 = vmatprep.mubr.bf16.mxu1 %v370_v4 }
 0x107   :  { %2290 = vmatpush1.bf16.msra.mxu0 %v4844_v19  ;;  %2505 = vmatpush1.bf16.msra.mxu1 %v4847_v20  ;;  %v4927_v19 = vld [vmem:[#allocation5 + $0x5cc] ss:$16 sps:$4 sm:$0xff]  }
 0x108   :  { %2291 = vmatprep.subr.bf16.mxu0 %v4852_v21  ;;  %2506 = vmatprep.subr.bf16.mxu1 %v4855_v22  ;;  %v5038_v20 = vld [vmem:[#allocation2 + $0xc] ss:$20 sps:$4 sm:$0xff]   ;;  %v5039_v21 = vld [vmem:[#allocation2 + $0x34] ss:$20 sps:$4 sm:$0xff]   ;;  %v5040_v22 = vld [vmem:[#allocation2 + $0x5c] ss:$20 sps:$4 sm:$0xff]  }
 0x109   :  { %v5743_v52 = vrot.slane %v5038_v20, %v5700_v54  ;;  %v5746_v53 = vrot.slane %v5039_v21, %v5700_v54  ;;  %v5749_v55 = vrot.slane %v5040_v22, %v5700_v54  ;;  %v5002_v20 = vld [vmem:[#allocation5 + $0x740] ss:$16 sps:$4 sm:$0xff]   ;;  %v5005_v21 = vld [vmem:[#allocation5 + $0x748] ss:$16 sps:$4 sm:$0xff]   ;;  %v5010_v22 = vld [vmem:[#allocation5 + $0x764] ss:$16 sps:$4 sm:$0xff]  }
 0x10b   :  { %2292 = vmatpush1.bf16.msra.mxu0 %v4850_v46  ;;  %2507 = vmatpush1.bf16.msra.mxu1 %v4853_v47  ;;  %v5041_v46 = vld [vmem:[#allocation2 + $0x84] ss:$20 sps:$4 sm:$0xff]   ;;  %v4922_v47 = vld [vmem:[#allocation5 + $0x5c0] ss:$16 sps:$4 sm:$0xff]  }
 0x10c   :  { %2293 = vmatprep.subr.bf16.mxu0 %v4858_v49  ;;  %2508 = vmatprep.subr.bf16.mxu1 %v4861_v50  ;;  %v4925_v49 = vld [vmem:[#allocation5 + $0x5c8] ss:$16 sps:$4 sm:$0xff]   ;;  %v4930_v50 = vld [vmem:[#allocation5 + $0x5e4] ss:$16 sps:$4 sm:$0xff]  }
 0x10f   :  { %2294 = vmatpush1.bf16.msra.mxu0 %v4856_v59  ;;  %2509 = vmatpush1.bf16.msra.mxu1 %v4859_v60  ;;  %v5752_v59 = vrot.slane %v5041_v46, %v5700_v54  ;;  %v4928_v60 = vld [vmem:[#allocation5 + $0x5e0] ss:$16 sps:$4 sm:$0xff]   ;;  %v5013_v46 = vld [vmem:[#allocation5 + $0x76c] ss:$16 sps:$4 sm:$0xff]  }
 0x110   :  { %2295 = vmatprep.subr.bf16.mxu0 %v4864_v62  ;;  %2510 = vmatprep.subr.bf16.mxu1 %v4867_v0  ;;  %v4931_v62 = vld [vmem:[#allocation5 + $0x5e8] ss:$16 sps:$4 sm:$0xff]   ;;  %v323_v0 = vcombine.low %v5733_v58, %v5736_v61  ;;  %v4948_v61 = vld [vmem:[#allocation5 + $0x620] ss:$16 sps:$4 sm:$0xff]  }
 0x111   :  { %v326_v4 = vcombine.high %v5749_v55, %v5752_v59 }
 0x113   :  { %2296 = vmatpush1.bf16.msra.mxu0 %v4862_v2  ;;  %2511 = vmatpush1.bf16.msra.mxu1 %v4865_v3  ;;  %v4947_v2 = vld [vmem:[#allocation5 + $0x60c] ss:$16 sps:$4 sm:$0xff]   ;;  %v236_v3 = vcombine.high %v5743_v52, %v5746_v53 }
 0x114   :  { %2297 = vmatprep.subr.bf16.mxu0 %v4870_v5  ;;  %2512 = vmatprep.subr.bf16.mxu1 %v4873_v6  ;;  %v4942_v5 = vld [vmem:[#allocation5 + $0x600] ss:$16 sps:$4 sm:$0xff]   ;;  %v4945_v6 = vld [vmem:[#allocation5 + $0x608] ss:$16 sps:$4 sm:$0xff]  }
 0x115   :  { %v372_v58 = vpack.c.bf16 %v326_v4, %v236_v3  ;;  %v5028_v3 = vld [vmem:[#allocation5 + $0x7c4] ss:$16 sps:$4 sm:$0xff]   ;;  %v5031_v4 = vld [vmem:[#allocation5 + $0x7cc] ss:$16 sps:$4 sm:$0xff]  }
 0x117   :  { %2298 = vmatpush1.bf16.msra.mxu0 %v4868_v7  ;;  %2513 = vmatpush1.bf16.msra.mxu1 %v4871_v8  ;;  %v369_v7 = vpack.c.bf16 %v323_v0, %v233_v63  ;;  %v4951_v8 = vld [vmem:[#allocation5 + $0x628] ss:$16 sps:$4 sm:$0xff]   ;;  %v5022_v63 = vld [vmem:[#allocation5 + $0x7a4] ss:$16 sps:$4 sm:$0xff]   ;;  %v5025_v0 = vld [vmem:[#allocation5 + $0x7ac] ss:$16 sps:$4 sm:$0xff]  }
 0x118   :  { %2299 = vmatprep.subr.bf16.mxu0 %v4876_v9  ;;  %2514 = vmatprep.subr.bf16.mxu1 %v4879_v10  ;;  %v4956_v9 = vld [vmem:[#allocation5 + $0x644] ss:$16 sps:$4 sm:$0xff]   ;;  %v4959_v10 = vld [vmem:[#allocation5 + $0x64c] ss:$16 sps:$4 sm:$0xff]  }
 0x11b   :  { %2300 = vmatpush1.bf16.msra.mxu0 %v4874_v11  ;;  %2515 = vmatpush1.bf16.msra.mxu1 %v4877_v12  ;;  %v4954_v11 = vld [vmem:[#allocation5 + $0x640] ss:$16 sps:$4 sm:$0xff]   ;;  %v4957_v12 = vld [vmem:[#allocation5 + $0x648] ss:$16 sps:$4 sm:$0xff]  }
 0x11c   :  { %2301 = vmatprep.subr.bf16.mxu0 %v4882_v13  ;;  %2516 = vmatprep.subr.bf16.mxu1 %v4885_v14  ;;  %v4962_v13 = vld [vmem:[#allocation5 + $0x664] ss:$16 sps:$4 sm:$0xff]   ;;  %v4965_v14 = vld [vmem:[#allocation5 + $0x66c] ss:$16 sps:$4 sm:$0xff]  }
 0x11f   :  { %2302 = vmatpush1.bf16.msra.mxu0 %v4880_v15  ;;  %2517 = vmatpush1.bf16.msra.mxu1 %v4883_v16  ;;  %v4960_v15 = vld [vmem:[#allocation5 + $0x660] ss:$16 sps:$4 sm:$0xff]   ;;  %v4963_v16 = vld [vmem:[#allocation5 + $0x668] ss:$16 sps:$4 sm:$0xff]  }
 0x120   :  { %2303 = vmatprep.subr.bf16.mxu0 %v4888_v17  ;;  %2518 = vmatprep.subr.bf16.mxu1 %v4891_v18  ;;  %v4968_v17 = vld [vmem:[#allocation5 + $0x684] ss:$16 sps:$4 sm:$0xff]   ;;  %v4971_v18 = vld [vmem:[#allocation5 + $0x68c] ss:$16 sps:$4 sm:$0xff]  }
 0x123   :  { %2304 = vmatpush1.bf16.msra.mxu0 %v4886_v23  ;;  %2519 = vmatpush1.bf16.msra.mxu1 %v4889_v24  ;;  %v4966_v23 = vld [vmem:[#allocation5 + $0x680] ss:$16 sps:$4 sm:$0xff]   ;;  %v4969_v24 = vld [vmem:[#allocation5 + $0x688] ss:$16 sps:$4 sm:$0xff]  }
 0x124   :  { %2305 = vmatprep.subr.bf16.mxu0 %v4894_v25  ;;  %2520 = vmatprep.subr.bf16.mxu1 %v4897_v26  ;;  %v4974_v25 = vld [vmem:[#allocation5 + $0x6a4] ss:$16 sps:$4 sm:$0xff]   ;;  %v4977_v26 = vld [vmem:[#allocation5 + $0x6ac] ss:$16 sps:$4 sm:$0xff]  }
 0x127   :  { %2306 = vmatpush1.bf16.msra.mxu0 %v4892_v27  ;;  %2521 = vmatpush1.bf16.msra.mxu1 %v4895_v28  ;;  %v4972_v27 = vld [vmem:[#allocation5 + $0x6a0] ss:$16 sps:$4 sm:$0xff]   ;;  %v4975_v28 = vld [vmem:[#allocation5 + $0x6a8] ss:$16 sps:$4 sm:$0xff]  }
 0x128   :  { %2307 = vmatprep.subr.bf16.mxu0 %v4900_v29  ;;  %2522 = vmatprep.subr.bf16.mxu1 %v4903_v30  ;;  %v4980_v29 = vld [vmem:[#allocation5 + $0x6c4] ss:$16 sps:$4 sm:$0xff]   ;;  %v4983_v30 = vld [vmem:[#allocation5 + $0x6cc] ss:$16 sps:$4 sm:$0xff]  }
 0x12b   :  { %2308 = vmatpush1.bf16.msra.mxu0 %v4898_v31  ;;  %2523 = vmatpush1.bf16.msra.mxu1 %v4901_v32  ;;  %v4978_v31 = vld [vmem:[#allocation5 + $0x6c0] ss:$16 sps:$4 sm:$0xff]   ;;  %v4981_v32 = vld [vmem:[#allocation5 + $0x6c8] ss:$16 sps:$4 sm:$0xff]  }
 0x12c   :  { %2309 = vmatprep.subr.bf16.mxu0 %v4906_v33  ;;  %2524 = vmatprep.subr.bf16.mxu1 %v4909_v34  ;;  %v4986_v33 = vld [vmem:[#allocation5 + $0x6e4] ss:$16 sps:$4 sm:$0xff]   ;;  %v4989_v34 = vld [vmem:[#allocation5 + $0x6ec] ss:$16 sps:$4 sm:$0xff]  }
 0x12f   :  { %2310 = vmatpush1.bf16.msra.mxu0 %v4904_v35  ;;  %2525 = vmatpush1.bf16.msra.mxu1 %v4907_v36  ;;  %v4984_v35 = vld [vmem:[#allocation5 + $0x6e0] ss:$16 sps:$4 sm:$0xff]   ;;  %v4987_v36 = vld [vmem:[#allocation5 + $0x6e8] ss:$16 sps:$4 sm:$0xff]  }
 0x130   :  { %2311 = vmatprep.subr.bf16.mxu0 %v4912_v37  ;;  %2526 = vmatprep.subr.bf16.mxu1 %v4915_v38  ;;  %v4992_v37 = vld [vmem:[#allocation5 + $0x704] ss:$16 sps:$4 sm:$0xff]   ;;  %v4995_v38 = vld [vmem:[#allocation5 + $0x70c] ss:$16 sps:$4 sm:$0xff]  }
 0x133   :  { %2312 = vmatpush1.bf16.msra.mxu0 %v4910_v39  ;;  %2527 = vmatpush1.bf16.msra.mxu1 %v4913_v40  ;;  %v4990_v39 = vld [vmem:[#allocation5 + $0x700] ss:$16 sps:$4 sm:$0xff]   ;;  %v4993_v40 = vld [vmem:[#allocation5 + $0x708] ss:$16 sps:$4 sm:$0xff]  }
 0x134   :  { %2313 = vmatprep.subr.bf16.mxu0 %v4918_v41  ;;  %2528 = vmatprep.subr.bf16.mxu1 %v4921_v42  ;;  %v4998_v41 = vld [vmem:[#allocation5 + $0x724] ss:$16 sps:$4 sm:$0xff]   ;;  %v5001_v42 = vld [vmem:[#allocation5 + $0x72c] ss:$16 sps:$4 sm:$0xff]  }
 0x137   :  { %2314 = vmatpush1.bf16.msra.mxu0 %v4916_v43  ;;  %2529 = vmatpush1.bf16.msra.mxu1 %v4919_v44  ;;  %v4996_v43 = vld [vmem:[#allocation5 + $0x720] ss:$16 sps:$4 sm:$0xff]   ;;  %v4999_v44 = vld [vmem:[#allocation5 + $0x728] ss:$16 sps:$4 sm:$0xff]  }
 0x138   :  { %2315 = vmatprep.subr.bf16.mxu0 %v4924_v45  ;;  %2530 = vmatprep.subr.bf16.mxu1 %v4927_v19  ;;  %v5004_v45 = vld [vmem:[#allocation5 + $0x744] ss:$16 sps:$4 sm:$0xff]   ;;  %v5007_v19 = vld [vmem:[#allocation5 + $0x74c] ss:$16 sps:$4 sm:$0xff]  }
 0x13b   :  { %2316 = vmatpush1.bf16.msra.mxu0 %v4922_v47  ;;  %2531 = vmatpush1.bf16.msra.mxu1 %v4925_v49  ;;  %v5008_v47 = vld [vmem:[#allocation5 + $0x760] ss:$16 sps:$4 sm:$0xff]   ;;  %v5011_v49 = vld [vmem:[#allocation5 + $0x768] ss:$16 sps:$4 sm:$0xff]  }
 0x13c   :  { %2317 = vmatprep.subr.bf16.mxu0 %v4930_v50  ;;  %2532 = vmatprep.subr.bf16.mxu1 %v4933_v51  ;;  %v5016_v50 = vld [vmem:[#allocation5 + $0x784] ss:$16 sps:$4 sm:$0xff]   ;;  %v5019_v51 = vld [vmem:[#allocation5 + $0x78c] ss:$16 sps:$4 sm:$0xff]  }
 0x13f   :  { %2318 = vmatpush1.bf16.msra.mxu0 %v4928_v60  ;;  %2533 = vmatpush1.bf16.msra.mxu1 %v4931_v62  ;;  %v5014_v60 = vld [vmem:[#allocation5 + $0x780] ss:$16 sps:$4 sm:$0xff]   ;;  %v5017_v62 = vld [vmem:[#allocation5 + $0x788] ss:$16 sps:$4 sm:$0xff]  }
 0x140   :  { %2330 = vmatprep.subr.bf16.mxu0 %v4944_v1  ;;  %2545 = vmatprep.subr.bf16.mxu1 %v4947_v2  ;;  %v5020_v1 = vld [vmem:[#allocation5 + $0x7a0] ss:$16 sps:$4 sm:$0xff]   ;;  %v5023_v2 = vld [vmem:[#allocation5 + $0x7a8] ss:$16 sps:$4 sm:$0xff]  }
 0x142   :  { %2320 = vmatmul.mubr.bf16.vlgmr.msra.gmra.mrb[0].mxu0 %v369_v7  ;;  %2535 = vmatmul.mubr.bf16.vlgmr.msra.gmra.mrb[0].mxu1 %v369_v7  ;;  %v5029_v7 = vld [vmem:[#allocation5 + $0x7c8] ss:$16 sps:$4 sm:$0xff]  }
 0x143   :  { %2331 = vmatpush1.bf16.msra.mxu0 %v4942_v5  ;;  %2546 = vmatpush1.bf16.msra.mxu1 %v4945_v6  ;;  %v5108_v5 = vld [vmem:[#allocation2 + $0x10] ss:$20 sps:$4 sm:$0xff]  }
 0x144   :  { %2332 = vmatprep.subr.bf16.mxu0 %v4950_v56  ;;  %2547 = vmatprep.subr.bf16.mxu1 %v4953_v57  ;;  %v5026_v6 = vld [vmem:[#allocation5 + $0x7c0] ss:$16 sps:$4 sm:$0xff]   ;;  %v5109_v56 = vld [vmem:[#allocation2 + $0x38] ss:$20 sps:$4 sm:$0xff]  }
 0x145   :  { %2362 = vmatprep.mubr.bf16.mxu0 %v372_v58  ;;  %2577 = vmatprep.mubr.bf16.mxu1 %v372_v58  ;;  %v5110_v57 = vld [vmem:[#allocation2 + $0x60] ss:$20 sps:$4 sm:$0xff]   ;;  %v5111_v58 = vld [vmem:[#allocation2 + $0x88] ss:$20 sps:$4 sm:$0xff]  }
 0x147   :  { %2333 = vmatpush1.bf16.msra.mxu0 %v4948_v61  ;;  %2548 = vmatpush1.bf16.msra.mxu1 %v4951_v8  ;;  %v5034_v61 = vld [vmem:[#allocation5 + $0x7e4] ss:$16 sps:$4 sm:$0xff]   ;;  %v5037_v8 = vld [vmem:[#allocation5 + $0x7ec] ss:$16 sps:$4 sm:$0xff]  }
 0x148   :  { %2334 = vmatprep.subr.bf16.mxu0 %v4956_v9  ;;  %2549 = vmatprep.subr.bf16.mxu1 %v4959_v10  ;;  %v5032_v9 = vld [vmem:[#allocation5 + $0x7e0] ss:$16 sps:$4 sm:$0xff]   ;;  %v5035_v10 = vld [vmem:[#allocation5 + $0x7e8] ss:$16 sps:$4 sm:$0xff]  }
 0x14b   :  { %2335 = vmatpush1.bf16.msra.mxu0 %v4954_v11  ;;  %2550 = vmatpush1.bf16.msra.mxu1 %v4957_v12  ;;  %v5763_v11 = vrot.slane %v5108_v5, %v5700_v54  ;;  %v5766_v12 = vrot.slane %v5109_v56, %v5700_v54  ;;  %v5114_v56 = vld [vmem:[#allocation8 + $0x4] ss:$16 sps:$4 sm:$0xff]  }
 0x14c   :  { %2336 = vmatprep.subr.bf16.mxu0 %v4962_v13  ;;  %2551 = vmatprep.subr.bf16.mxu1 %v4965_v14  ;;  %v5769_v13 = vrot.slane %v5110_v57, %v5700_v54  ;;  %v5772_v14 = vrot.slane %v5111_v58, %v5700_v54  ;;  %v5117_v57 = vld [vmem:[#allocation8 + $0xc] ss:$16 sps:$4 sm:$0xff]  }
 0x14e   :  { %v344_v54 = vcombine.high %v5769_v13, %v5772_v14  ;;  %v343_v5 = vcombine.low %v5769_v13, %v5772_v14  ;;  %v5126_v13 = vld [vmem:[#allocation8 + $0x44] ss:$16 sps:$4 sm:$0xff]   ;;  %v5129_v14 = vld [vmem:[#allocation8 + $0x4c] ss:$16 sps:$4 sm:$0xff]  }
 0x14f   :  { %2337 = vmatpush1.bf16.msra.mxu0 %v4960_v15  ;;  %2552 = vmatpush1.bf16.msra.mxu1 %v4963_v16  ;;  %v5044_v15 = vld [vmem:[#allocation5 + $0x804] ss:$16 sps:$4 sm:$0xff]   ;;  %v5047_v16 = vld [vmem:[#allocation5 + $0x80c] ss:$16 sps:$4 sm:$0xff]  }
 0x150   :  { %2338 = vmatprep.subr.bf16.mxu0 %v4968_v17  ;;  %2553 = vmatprep.subr.bf16.mxu1 %v4971_v18  ;;  %v235_v17 = vcombine.low %v5743_v52, %v5746_v53  ;;  %v325_v18 = vcombine.low %v5749_v55, %v5752_v59  ;;  %v5048_v52 = vld [vmem:[#allocation5 + $0x820] ss:$16 sps:$4 sm:$0xff]   ;;  %v5051_v53 = vld [vmem:[#allocation5 + $0x828] ss:$16 sps:$4 sm:$0xff]   ;;  %v5056_v59 = vld [vmem:[#allocation5 + $0x844] ss:$16 sps:$4 sm:$0xff]  }
 0x153   :  { %2339 = vmatpush1.bf16.msra.mxu0 %v4966_v23  ;;  %2554 = vmatpush1.bf16.msra.mxu1 %v4969_v24  ;;  %v5042_v23 = vld [vmem:[#allocation5 + $0x800] ss:$16 sps:$4 sm:$0xff]   ;;  %v5045_v24 = vld [vmem:[#allocation5 + $0x808] ss:$16 sps:$4 sm:$0xff]  }
 0x154   :  { %2340 = vmatprep.subr.bf16.mxu0 %v4974_v25  ;;  %2555 = vmatprep.subr.bf16.mxu1 %v4977_v26  ;;  %v254_v25 = vcombine.high %v5763_v11, %v5766_v12  ;;  %v371_v26 = vpack.c.bf16 %v325_v18, %v235_v17  ;;  %v5132_v17 = vld [vmem:[#allocation8 + $0x64] ss:$16 sps:$4 sm:$0xff]   ;;  %v5135_v18 = vld [vmem:[#allocation8 + $0x6c] ss:$16 sps:$4 sm:$0xff]  }
 0x156   :  { %v374_v55 = vpack.c.bf16 %v344_v54, %v254_v25  ;;  %v5138_v25 = vld [vmem:[#allocation8 + $0x84] ss:$16 sps:$4 sm:$0xff]   ;;  %v5141_v54 = vld [vmem:[#allocation8 + $0x8c] ss:$16 sps:$4 sm:$0xff]  }
 0x157   :  { %2341 = vmatpush1.bf16.msra.mxu0 %v4972_v27  ;;  %2556 = vmatpush1.bf16.msra.mxu1 %v4975_v28  ;;  %v5050_v27 = vld [vmem:[#allocation5 + $0x824] ss:$16 sps:$4 sm:$0xff]   ;;  %v5053_v28 = vld [vmem:[#allocation5 + $0x82c] ss:$16 sps:$4 sm:$0xff]  }
 0x158   :  { %2342 = vmatprep.subr.bf16.mxu0 %v4980_v29  ;;  %2557 = vmatprep.subr.bf16.mxu1 %v4983_v30  ;;  %v5059_v29 = vld [vmem:[#allocation5 + $0x84c] ss:$16 sps:$4 sm:$0xff]   ;;  %v5054_v30 = vld [vmem:[#allocation5 + $0x840] ss:$16 sps:$4 sm:$0xff]  }
 0x15b   :  { %2343 = vmatpush1.bf16.msra.mxu0 %v4978_v31  ;;  %2558 = vmatpush1.bf16.msra.mxu1 %v4981_v32  ;;  %v5057_v31 = vld [vmem:[#allocation5 + $0x848] ss:$16 sps:$4 sm:$0xff]   ;;  %v5062_v32 = vld [vmem:[#allocation5 + $0x864] ss:$16 sps:$4 sm:$0xff]  }
 0x15c   :  { %2344 = vmatprep.subr.bf16.mxu0 %v4986_v33  ;;  %2559 = vmatprep.subr.bf16.mxu1 %v4989_v34  ;;  %v5065_v33 = vld [vmem:[#allocation5 + $0x86c] ss:$16 sps:$4 sm:$0xff]   ;;  %v5060_v34 = vld [vmem:[#allocation5 + $0x860] ss:$16 sps:$4 sm:$0xff]  }
 0x15f   :  { %2345 = vmatpush1.bf16.msra.mxu0 %v4984_v35  ;;  %2560 = vmatpush1.bf16.msra.mxu1 %v4987_v36  ;;  %v5063_v35 = vld [vmem:[#allocation5 + $0x868] ss:$16 sps:$4 sm:$0xff]   ;;  %v5068_v36 = vld [vmem:[#allocation5 + $0x884] ss:$16 sps:$4 sm:$0xff]  }
 0x160   :  { %2346 = vmatprep.subr.bf16.mxu0 %v4992_v37  ;;  %2561 = vmatprep.subr.bf16.mxu1 %v4995_v38  ;;  %v5071_v37 = vld [vmem:[#allocation5 + $0x88c] ss:$16 sps:$4 sm:$0xff]   ;;  %v5066_v38 = vld [vmem:[#allocation5 + $0x880] ss:$16 sps:$4 sm:$0xff]  }
 0x163   :  { %2347 = vmatpush1.bf16.msra.mxu0 %v4990_v39  ;;  %2562 = vmatpush1.bf16.msra.mxu1 %v4993_v40  ;;  %v5069_v39 = vld [vmem:[#allocation5 + $0x888] ss:$16 sps:$4 sm:$0xff]   ;;  %v5074_v40 = vld [vmem:[#allocation5 + $0x8a4] ss:$16 sps:$4 sm:$0xff]  }
 0x164   :  { %2348 = vmatprep.subr.bf16.mxu0 %v4998_v41  ;;  %2563 = vmatprep.subr.bf16.mxu1 %v5001_v42  ;;  %v5077_v41 = vld [vmem:[#allocation5 + $0x8ac] ss:$16 sps:$4 sm:$0xff]   ;;  %v5072_v42 = vld [vmem:[#allocation5 + $0x8a0] ss:$16 sps:$4 sm:$0xff]  }
 0x167   :  { %2349 = vmatpush1.bf16.msra.mxu0 %v4996_v43  ;;  %2564 = vmatpush1.bf16.msra.mxu1 %v4999_v44  ;;  %v5075_v43 = vld [vmem:[#allocation5 + $0x8a8] ss:$16 sps:$4 sm:$0xff]   ;;  %v5080_v44 = vld [vmem:[#allocation5 + $0x8c4] ss:$16 sps:$4 sm:$0xff]  }
 0x168   :  { %2350 = vmatprep.subr.bf16.mxu0 %v5004_v45  ;;  %2565 = vmatprep.subr.bf16.mxu1 %v5007_v19  ;;  %v5083_v45 = vld [vmem:[#allocation5 + $0x8cc] ss:$16 sps:$4 sm:$0xff]   ;;  %v5078_v19 = vld [vmem:[#allocation5 + $0x8c0] ss:$16 sps:$4 sm:$0xff]  }
 0x16b   :  { %2351 = vmatpush1.bf16.msra.mxu0 %v5002_v20  ;;  %2566 = vmatpush1.bf16.msra.mxu1 %v5005_v21  ;;  %v5081_v20 = vld [vmem:[#allocation5 + $0x8c8] ss:$16 sps:$4 sm:$0xff]   ;;  %v5086_v21 = vld [vmem:[#allocation5 + $0x8e4] ss:$16 sps:$4 sm:$0xff]  }
 0x16c   :  { %2352 = vmatprep.subr.bf16.mxu0 %v5010_v22  ;;  %2567 = vmatprep.subr.bf16.mxu1 %v5013_v46  ;;  %v5089_v22 = vld [vmem:[#allocation5 + $0x8ec] ss:$16 sps:$4 sm:$0xff]   ;;  %v5084_v46 = vld [vmem:[#allocation5 + $0x8e0] ss:$16 sps:$4 sm:$0xff]  }
 0x16f   :  { %2353 = vmatpush1.bf16.msra.mxu0 %v5008_v47  ;;  %2568 = vmatpush1.bf16.msra.mxu1 %v5011_v49  ;;  %v5087_v47 = vld [vmem:[#allocation5 + $0x8e8] ss:$16 sps:$4 sm:$0xff]   ;;  %v5092_v49 = vld [vmem:[#allocation5 + $0x904] ss:$16 sps:$4 sm:$0xff]  }
 0x170   :  { %2354 = vmatprep.subr.bf16.mxu0 %v5016_v50  ;;  %2569 = vmatprep.subr.bf16.mxu1 %v5019_v51  ;;  %v5095_v50 = vld [vmem:[#allocation5 + $0x90c] ss:$16 sps:$4 sm:$0xff]   ;;  %v5090_v51 = vld [vmem:[#allocation5 + $0x900] ss:$16 sps:$4 sm:$0xff]  }
 0x173   :  { %2355 = vmatpush1.bf16.msra.mxu0 %v5014_v60  ;;  %2570 = vmatpush1.bf16.msra.mxu1 %v5017_v62  ;;  %v5093_v60 = vld [vmem:[#allocation5 + $0x908] ss:$16 sps:$4 sm:$0xff]   ;;  %v5098_v62 = vld [vmem:[#allocation5 + $0x924] ss:$16 sps:$4 sm:$0xff]  }
 0x174   :  { %2356 = vmatprep.subr.bf16.mxu0 %v5022_v63  ;;  %2571 = vmatprep.subr.bf16.mxu1 %v5025_v0  ;;  %v5101_v63 = vld [vmem:[#allocation5 + $0x92c] ss:$16 sps:$4 sm:$0xff]   ;;  %v5096_v0 = vld [vmem:[#allocation5 + $0x920] ss:$16 sps:$4 sm:$0xff]  }
 0x177   :  { %2357 = vmatpush1.bf16.msra.mxu0 %v5020_v1  ;;  %2572 = vmatpush1.bf16.msra.mxu1 %v5023_v2  ;;  %v5099_v1 = vld [vmem:[#allocation5 + $0x928] ss:$16 sps:$4 sm:$0xff]   ;;  %v5104_v2 = vld [vmem:[#allocation5 + $0x944] ss:$16 sps:$4 sm:$0xff]  }
 0x178   :  { %2358 = vmatprep.subr.bf16.mxu0 %v5028_v3  ;;  %2573 = vmatprep.subr.bf16.mxu1 %v5031_v4  ;;  %v5107_v3 = vld [vmem:[#allocation5 + $0x94c] ss:$16 sps:$4 sm:$0xff]   ;;  %v253_v4 = vcombine.low %v5763_v11, %v5766_v12  ;;  %v5118_v11 = vld [vmem:[#allocation8 + $0x20] ss:$16 sps:$4 sm:$0xff]  }
 0x179   :  { %v5121_v12 = vld [vmem:[#allocation8 + $0x28] ss:$16 sps:$4 sm:$0xff]  }
 0x17a   :  { %v373_v58 = vpack.c.bf16 %v343_v5, %v253_v4  ;;  %v5196_v4 = vld [vmem:[#allocation8 + $0x1c0] ss:$16 sps:$4 sm:$0xff]   ;;  %v5199_v5 = vld [vmem:[#allocation8 + $0x1c8] ss:$16 sps:$4 sm:$0xff]  }
 0x17b   :  { %2359 = vmatpush1.bf16.msra.mxu0 %v5026_v6  ;;  %2574 = vmatpush1.bf16.msra.mxu1 %v5029_v7  ;;  %v5102_v6 = vld [vmem:[#allocation5 + $0x940] ss:$16 sps:$4 sm:$0xff]   ;;  %v5105_v7 = vld [vmem:[#allocation5 + $0x948] ss:$16 sps:$4 sm:$0xff]  }
 0x17c   :  { %2360 = vmatprep.subr.bf16.mxu0 %v5034_v61  ;;  %2575 = vmatprep.subr.bf16.mxu1 %v5037_v8  ;;  %v5112_v61 = vld [vmem:[#allocation8] ss:$16 sps:$4 sm:$0xff]   ;;  %v5115_v8 = vld [vmem:[#allocation8 + $0x8] ss:$16 sps:$4 sm:$0xff]  }
 0x17f   :  { %2361 = vmatpush1.bf16.msra.mxu0 %v5032_v9  ;;  %2576 = vmatpush1.bf16.msra.mxu1 %v5035_v10  ;;  %v5120_v9 = vld [vmem:[#allocation8 + $0x24] ss:$16 sps:$4 sm:$0xff]   ;;  %v5123_v10 = vld [vmem:[#allocation8 + $0x2c] ss:$16 sps:$4 sm:$0xff]  }
 0x180   :  { %2373 = vmatprep.subr.bf16.mxu0 %v5044_v15  ;;  %2588 = vmatprep.subr.bf16.mxu1 %v5047_v16  ;;  %v5124_v15 = vld [vmem:[#allocation8 + $0x40] ss:$16 sps:$4 sm:$0xff]   ;;  %v5127_v16 = vld [vmem:[#allocation8 + $0x48] ss:$16 sps:$4 sm:$0xff]  }
 0x182   :  { %2363 = vmatmul.mubr.bf16.vlgmr.msra.gmra.mrb[0].mxu0 %v371_v26  ;;  %2578 = vmatmul.mubr.bf16.vlgmr.msra.gmra.mrb[0].mxu1 %v371_v26  ;;  %v5136_v26 = vld [vmem:[#allocation8 + $0x80] ss:$16 sps:$4 sm:$0xff]  }
 0x183   :  { %2374 = vmatpush1.bf16.msra.mxu0 %v5042_v23  ;;  %2589 = vmatpush1.bf16.msra.mxu1 %v5045_v24  ;;  %v5130_v23 = vld [vmem:[#allocation8 + $0x60] ss:$16 sps:$4 sm:$0xff]   ;;  %v5133_v24 = vld [vmem:[#allocation8 + $0x68] ss:$16 sps:$4 sm:$0xff]  }
 0x184   :  { %2375 = vmatprep.subr.bf16.mxu0 %v5050_v27  ;;  %2590 = vmatprep.subr.bf16.mxu1 %v5053_v28  ;;  %v5139_v27 = vld [vmem:[#allocation8 + $0x88] ss:$16 sps:$4 sm:$0xff]   ;;  %v5144_v28 = vld [vmem:[#allocation8 + $0xa4] ss:$16 sps:$4 sm:$0xff]  }
 0x185   :  { %4349 = vmatprep.mubr.msk.bf16.mxu0 %vm2197_vm0, %v374_v55  ;;  %4350 = vmatprep.mubr.msk.bf16.mxu1 %vm2197_vm0, %v374_v55  ;;  %v5145_v55 = vld [vmem:[#allocation8 + $0xa8] ss:$16 sps:$4 sm:$0xff]  }
 0x187   :  { %2376 = vmatpush1.bf16.msra.mxu0 %v5048_v52  ;;  %2591 = vmatpush1.bf16.msra.mxu1 %v5051_v53  ;;  %v5147_v52 = vld [vmem:[#allocation8 + $0xac] ss:$16 sps:$4 sm:$0xff]   ;;  %v5142_v53 = vld [vmem:[#allocation8 + $0xa0] ss:$16 sps:$4 sm:$0xff]  }
 0x188   :  { %2377 = vmatprep.subr.bf16.mxu0 %v5056_v59  ;;  %2592 = vmatprep.subr.bf16.mxu1 %v5059_v29  ;;  %v5150_v59 = vld [vmem:[#allocation8 + $0xc4] ss:$16 sps:$4 sm:$0xff]   ;;  %v5153_v29 = vld [vmem:[#allocation8 + $0xcc] ss:$16 sps:$4 sm:$0xff]  }
 0x18b   :  { %2378 = vmatpush1.bf16.msra.mxu0 %v5054_v30  ;;  %2593 = vmatpush1.bf16.msra.mxu1 %v5057_v31  ;;  %v5148_v30 = vld [vmem:[#allocation8 + $0xc0] ss:$16 sps:$4 sm:$0xff]   ;;  %v5151_v31 = vld [vmem:[#allocation8 + $0xc8] ss:$16 sps:$4 sm:$0xff]  }
 0x18c   :  { %2379 = vmatprep.subr.bf16.mxu0 %v5062_v32  ;;  %2594 = vmatprep.subr.bf16.mxu1 %v5065_v33  ;;  %v5156_v32 = vld [vmem:[#allocation8 + $0xe4] ss:$16 sps:$4 sm:$0xff]   ;;  %v5159_v33 = vld [vmem:[#allocation8 + $0xec] ss:$16 sps:$4 sm:$0xff]  }
 0x18f   :  { %2380 = vmatpush1.bf16.msra.mxu0 %v5060_v34  ;;  %2595 = vmatpush1.bf16.msra.mxu1 %v5063_v35  ;;  %v5154_v34 = vld [vmem:[#allocation8 + $0xe0] ss:$16 sps:$4 sm:$0xff]   ;;  %v5157_v35 = vld [vmem:[#allocation8 + $0xe8] ss:$16 sps:$4 sm:$0xff]  }
 0x190   :  { %2381 = vmatprep.subr.bf16.mxu0 %v5068_v36  ;;  %2596 = vmatprep.subr.bf16.mxu1 %v5071_v37  ;;  %v5162_v36 = vld [vmem:[#allocation8 + $0x104] ss:$16 sps:$4 sm:$0xff]   ;;  %v5165_v37 = vld [vmem:[#allocation8 + $0x10c] ss:$16 sps:$4 sm:$0xff]  }
 0x193   :  { %2382 = vmatpush1.bf16.msra.mxu0 %v5066_v38  ;;  %2597 = vmatpush1.bf16.msra.mxu1 %v5069_v39  ;;  %v5160_v38 = vld [vmem:[#allocation8 + $0x100] ss:$16 sps:$4 sm:$0xff]   ;;  %v5163_v39 = vld [vmem:[#allocation8 + $0x108] ss:$16 sps:$4 sm:$0xff]  }
 0x194   :  { %2383 = vmatprep.subr.bf16.mxu0 %v5074_v40  ;;  %2598 = vmatprep.subr.bf16.mxu1 %v5077_v41  ;;  %v5168_v40 = vld [vmem:[#allocation8 + $0x124] ss:$16 sps:$4 sm:$0xff]   ;;  %v5171_v41 = vld [vmem:[#allocation8 + $0x12c] ss:$16 sps:$4 sm:$0xff]  }
 0x197   :  { %2384 = vmatpush1.bf16.msra.mxu0 %v5072_v42  ;;  %2599 = vmatpush1.bf16.msra.mxu1 %v5075_v43  ;;  %v5166_v42 = vld [vmem:[#allocation8 + $0x120] ss:$16 sps:$4 sm:$0xff]   ;;  %v5169_v43 = vld [vmem:[#allocation8 + $0x128] ss:$16 sps:$4 sm:$0xff]  }
 0x198   :  { %2385 = vmatprep.subr.bf16.mxu0 %v5080_v44  ;;  %2600 = vmatprep.subr.bf16.mxu1 %v5083_v45  ;;  %v5174_v44 = vld [vmem:[#allocation8 + $0x144] ss:$16 sps:$4 sm:$0xff]   ;;  %v5177_v45 = vld [vmem:[#allocation8 + $0x14c] ss:$16 sps:$4 sm:$0xff]  }
 0x19b   :  { %2386 = vmatpush1.bf16.msra.mxu0 %v5078_v19  ;;  %2601 = vmatpush1.bf16.msra.mxu1 %v5081_v20  ;;  %v5172_v19 = vld [vmem:[#allocation8 + $0x140] ss:$16 sps:$4 sm:$0xff]   ;;  %v5175_v20 = vld [vmem:[#allocation8 + $0x148] ss:$16 sps:$4 sm:$0xff]  }
 0x19c   :  { %2387 = vmatprep.subr.bf16.mxu0 %v5086_v21  ;;  %2602 = vmatprep.subr.bf16.mxu1 %v5089_v22  ;;  %v5180_v21 = vld [vmem:[#allocation8 + $0x164] ss:$16 sps:$4 sm:$0xff]   ;;  %v5183_v22 = vld [vmem:[#allocation8 + $0x16c] ss:$16 sps:$4 sm:$0xff]  }
 0x19f   :  { %2388 = vmatpush1.bf16.msra.mxu0 %v5084_v46  ;;  %2603 = vmatpush1.bf16.msra.mxu1 %v5087_v47  ;;  %v5178_v46 = vld [vmem:[#allocation8 + $0x160] ss:$16 sps:$4 sm:$0xff]   ;;  %v5181_v47 = vld [vmem:[#allocation8 + $0x168] ss:$16 sps:$4 sm:$0xff]  }
 0x1a0   :  { %2389 = vmatprep.subr.bf16.mxu0 %v5092_v49  ;;  %2604 = vmatprep.subr.bf16.mxu1 %v5095_v50  ;;  %v5186_v49 = vld [vmem:[#allocation8 + $0x184] ss:$16 sps:$4 sm:$0xff]   ;;  %v5189_v50 = vld [vmem:[#allocation8 + $0x18c] ss:$16 sps:$4 sm:$0xff]  }
 0x1a3   :  { %2390 = vmatpush1.bf16.msra.mxu0 %v5090_v51  ;;  %2605 = vmatpush1.bf16.msra.mxu1 %v5093_v60  ;;  %v5184_v51 = vld [vmem:[#allocation8 + $0x180] ss:$16 sps:$4 sm:$0xff]   ;;  %v5187_v60 = vld [vmem:[#allocation8 + $0x188] ss:$16 sps:$4 sm:$0xff]  }
 0x1a4   :  { %2391 = vmatprep.subr.bf16.mxu0 %v5098_v62  ;;  %2606 = vmatprep.subr.bf16.mxu1 %v5101_v63  ;;  %v5192_v62 = vld [vmem:[#allocation8 + $0x1a4] ss:$16 sps:$4 sm:$0xff]   ;;  %v5195_v63 = vld [vmem:[#allocation8 + $0x1ac] ss:$16 sps:$4 sm:$0xff]  }
 0x1a7   :  { %2392 = vmatpush1.bf16.msra.mxu0 %v5096_v0  ;;  %2607 = vmatpush1.bf16.msra.mxu1 %v5099_v1  ;;  %v5190_v0 = vld [vmem:[#allocation8 + $0x1a0] ss:$16 sps:$4 sm:$0xff]   ;;  %v5193_v1 = vld [vmem:[#allocation8 + $0x1a8] ss:$16 sps:$4 sm:$0xff]  }
 0x1a8   :  { %2393 = vmatprep.subr.bf16.mxu0 %v5104_v2  ;;  %2608 = vmatprep.subr.bf16.mxu1 %v5107_v3  ;;  %v5198_v2 = vld [vmem:[#allocation8 + $0x1c4] ss:$16 sps:$4 sm:$0xff]   ;;  %v5201_v3 = vld [vmem:[#allocation8 + $0x1cc] ss:$16 sps:$4 sm:$0xff]  }
 0x1ab   :  { %2394 = vmatpush1.bf16.msra.mxu0 %v5102_v6  ;;  %2609 = vmatpush1.bf16.msra.mxu1 %v5105_v7  ;;  %v5204_v6 = vld [vmem:[#allocation8 + $0x1e4] ss:$16 sps:$4 sm:$0xff]   ;;  %v5207_v7 = vld [vmem:[#allocation8 + $0x1ec] ss:$16 sps:$4 sm:$0xff]  }
 0x1ac   :  { %3433 = vmatprep.subr.bf16.mxu0 %v5114_v56  ;;  %3519 = vmatprep.subr.bf16.mxu1 %v5117_v57  ;;  %v5202_v56 = vld [vmem:[#allocation8 + $0x1e0] ss:$16 sps:$4 sm:$0xff]   ;;  %v5205_v57 = vld [vmem:[#allocation8 + $0x1e8] ss:$16 sps:$4 sm:$0xff]  }
 0x1ae   :  { %2406 = vmatmul.mubr.bf16.vlgmr.msra.gmra.mrb[0].mxu0 %v373_v58  ;;  %2621 = vmatmul.mubr.bf16.vlgmr.msra.gmra.mrb[0].mxu1 %v373_v58  ;;  %v5210_v58 = vld [vmem:[#allocation8 + $0x204] ss:$16 sps:$4 sm:$0xff]  }
 0x1af   :  { %3434 = vmatpush1.bf16.msra.mxu0 %v5112_v61  ;;  %3520 = vmatpush1.bf16.msra.mxu1 %v5115_v8  ;;  %v5213_v61 = vld [vmem:[#allocation8 + $0x20c] ss:$16 sps:$4 sm:$0xff]   ;;  %v679_v8 = vsub.s32 0, %v5697_v48 }
 0x1b0   :  { %3435 = vmatprep.subr.bf16.mxu0 %v5120_v9  ;;  %3521 = vmatprep.subr.bf16.mxu1 %v5123_v10  ;;  %v687_v9 = vsub.s32 2, %v5697_v48  ;;  %v675_v10 = vld [vmem:[#allocation7] sm:$0xf] }
 0x1b3   :  { %3436 = vmatpush1.bf16.msra.mxu0 %v5118_v11  ;;  %3522 = vmatpush1.bf16.msra.mxu1 %v5121_v12  ;;  %v683_v11 = vsub.s32 1, %v5697_v48  ;;  %v691_v12 = vsub.s32 3, %v5697_v48 }
 0x1b4   :  { %3437 = vmatprep.subr.bf16.mxu0 %v5126_v13  ;;  %3523 = vmatprep.subr.bf16.mxu1 %v5129_v14  ;;  %v680_v13 = vrot.slane %v675_v10, %v679_v8  ;;  %v688_v14 = vrot.slane %v675_v10, %v687_v9 }
 0x1b7   :  { %3438 = vmatpush1.bf16.msra.mxu0 %v5124_v15  ;;  %3524 = vmatpush1.bf16.msra.mxu1 %v5127_v16  ;;  %v684_v15 = vrot.slane %v675_v10, %v683_v11  ;;  %v692_v16 = vrot.slane %v675_v10, %v691_v12  ;;  %v5252_v10 = vld [vmem:[#allocation8 + $0x2e4] ss:$16 sps:$4 sm:$0xff]  }
 0x1b8   :  { %3439 = vmatprep.subr.bf16.mxu0 %v5132_v17  ;;  %3525 = vmatprep.subr.bf16.mxu1 %v5135_v18 }
 0x1bb   :  { %3440 = vmatpush1.bf16.msra.mxu0 %v5130_v23  ;;  %3526 = vmatpush1.bf16.msra.mxu1 %v5133_v24 }
 0x1bc   :  { %3441 = vmatprep.subr.bf16.mxu0 %v5138_v25  ;;  %3527 = vmatprep.subr.bf16.mxu1 %v5141_v54 }
 0x1bf   :  { %3442 = vmatpush1.bf16.msra.mxu0 %v5136_v26  ;;  %3528 = vmatpush1.bf16.msra.mxu1 %v5139_v27 }
 0x1c0   :  { %3443 = vmatprep.subr.bf16.mxu0 %v5144_v28  ;;  %3529 = vmatprep.subr.bf16.mxu1 %v5147_v52 }
 0x1c3   :  { %3444 = vmatpush1.bf16.msra.mxu0 %v5142_v53  ;;  %3530 = vmatpush1.bf16.msra.mxu1 %v5145_v55 }
 0x1c4   :  { %3445 = vmatprep.subr.bf16.mxu0 %v5150_v59  ;;  %3531 = vmatprep.subr.bf16.mxu1 %v5153_v29 }
 0x1c7   :  { %3446 = vmatpush1.bf16.msra.mxu0 %v5148_v30  ;;  %3532 = vmatpush1.bf16.msra.mxu1 %v5151_v31 }
 0x1c8   :  { %3447 = vmatprep.subr.bf16.mxu0 %v5156_v32  ;;  %3533 = vmatprep.subr.bf16.mxu1 %v5159_v33 }
 0x1cb   :  { %3448 = vmatpush1.bf16.msra.mxu0 %v5154_v34  ;;  %3534 = vmatpush1.bf16.msra.mxu1 %v5157_v35 }
 0x1cc   :  { %3449 = vmatprep.subr.bf16.mxu0 %v5162_v36  ;;  %3535 = vmatprep.subr.bf16.mxu1 %v5165_v37 }
 0x1cf   :  { %3450 = vmatpush1.bf16.msra.mxu0 %v5160_v38  ;;  %3536 = vmatpush1.bf16.msra.mxu1 %v5163_v39 }
 0x1d0   :  { %3451 = vmatprep.subr.bf16.mxu0 %v5168_v40  ;;  %3537 = vmatprep.subr.bf16.mxu1 %v5171_v41 }
 0x1d3   :  { %3452 = vmatpush1.bf16.msra.mxu0 %v5166_v42  ;;  %3538 = vmatpush1.bf16.msra.mxu1 %v5169_v43  ;;  %v5208_v43 = vld [vmem:[#allocation8 + $0x200] ss:$16 sps:$4 sm:$0xff]  }
 0x1d4   :  { %3453 = vmatprep.subr.bf16.mxu0 %v5174_v44  ;;  %3539 = vmatprep.subr.bf16.mxu1 %v5177_v45  ;;  %v5211_v44 = vld [vmem:[#allocation8 + $0x208] ss:$16 sps:$4 sm:$0xff]  }
 0x1d7   :  { %3454 = vmatpush1.bf16.msra.mxu0 %v5172_v19  ;;  %3540 = vmatpush1.bf16.msra.mxu1 %v5175_v20  ;;  %v5216_v19 = vld [vmem:[#allocation8 + $0x224] ss:$16 sps:$4 sm:$0xff]   ;;  %v5219_v20 = vld [vmem:[#allocation8 + $0x22c] ss:$16 sps:$4 sm:$0xff]  }
 0x1d8   :  { %3455 = vmatprep.subr.bf16.mxu0 %v5180_v21  ;;  %3541 = vmatprep.subr.bf16.mxu1 %v5183_v22  ;;  %v5214_v21 = vld [vmem:[#allocation8 + $0x220] ss:$16 sps:$4 sm:$0xff]   ;;  %v5217_v22 = vld [vmem:[#allocation8 + $0x228] ss:$16 sps:$4 sm:$0xff]  }
 0x1db   :  { %3456 = vmatpush1.bf16.msra.mxu0 %v5178_v46  ;;  %3542 = vmatpush1.bf16.msra.mxu1 %v5181_v47  ;;  %v5222_v46 = vld [vmem:[#allocation8 + $0x244] ss:$16 sps:$4 sm:$0xff]   ;;  %v5225_v47 = vld [vmem:[#allocation8 + $0x24c] ss:$16 sps:$4 sm:$0xff]  }
 0x1dc   :  { %3457 = vmatprep.subr.bf16.mxu0 %v5186_v49  ;;  %3543 = vmatprep.subr.bf16.mxu1 %v5189_v50  ;;  %v5220_v49 = vld [vmem:[#allocation8 + $0x240] ss:$16 sps:$4 sm:$0xff]   ;;  %v5223_v50 = vld [vmem:[#allocation8 + $0x248] ss:$16 sps:$4 sm:$0xff]  }
 0x1df   :  { %3458 = vmatpush1.bf16.msra.mxu0 %v5184_v51  ;;  %3544 = vmatpush1.bf16.msra.mxu1 %v5187_v60  ;;  %v5228_v51 = vld [vmem:[#allocation8 + $0x264] ss:$16 sps:$4 sm:$0xff]   ;;  %v5231_v60 = vld [vmem:[#allocation8 + $0x26c] ss:$16 sps:$4 sm:$0xff]  }
 0x1e0   :  { %3459 = vmatprep.subr.bf16.mxu0 %v5192_v62  ;;  %3545 = vmatprep.subr.bf16.mxu1 %v5195_v63  ;;  %v5226_v62 = vld [vmem:[#allocation8 + $0x260] ss:$16 sps:$4 sm:$0xff]   ;;  %v5229_v63 = vld [vmem:[#allocation8 + $0x268] ss:$16 sps:$4 sm:$0xff]  }
 0x1e3   :  { %3460 = vmatpush1.bf16.msra.mxu0 %v5190_v0  ;;  %3546 = vmatpush1.bf16.msra.mxu1 %v5193_v1  ;;  %v5234_v0 = vld [vmem:[#allocation8 + $0x284] ss:$16 sps:$4 sm:$0xff]   ;;  %v5237_v1 = vld [vmem:[#allocation8 + $0x28c] ss:$16 sps:$4 sm:$0xff]  }
 0x1e4   :  { %3461 = vmatprep.subr.bf16.mxu0 %v5198_v2  ;;  %3547 = vmatprep.subr.bf16.mxu1 %v5201_v3  ;;  %v5232_v2 = vld [vmem:[#allocation8 + $0x280] ss:$16 sps:$4 sm:$0xff]   ;;  %v5235_v3 = vld [vmem:[#allocation8 + $0x288] ss:$16 sps:$4 sm:$0xff]  }
 0x1e7   :  { %3462 = vmatpush1.bf16.msra.mxu0 %v5196_v4  ;;  %3548 = vmatpush1.bf16.msra.mxu1 %v5199_v5  ;;  %v5240_v4 = vld [vmem:[#allocation8 + $0x2a4] ss:$16 sps:$4 sm:$0xff]   ;;  %v5243_v5 = vld [vmem:[#allocation8 + $0x2ac] ss:$16 sps:$4 sm:$0xff]  }
 0x1e8   :  { %3463 = vmatprep.subr.bf16.mxu0 %v5204_v6  ;;  %3549 = vmatprep.subr.bf16.mxu1 %v5207_v7  ;;  %v5238_v6 = vld [vmem:[#allocation8 + $0x2a0] ss:$16 sps:$4 sm:$0xff]   ;;  %v5241_v7 = vld [vmem:[#allocation8 + $0x2a8] ss:$16 sps:$4 sm:$0xff]  }
 0x1eb   :  { %3464 = vmatpush1.bf16.msra.mxu0 %v5202_v56  ;;  %3550 = vmatpush1.bf16.msra.mxu1 %v5205_v57  ;;  %v5246_v56 = vld [vmem:[#allocation8 + $0x2c4] ss:$16 sps:$4 sm:$0xff]   ;;  %v5249_v57 = vld [vmem:[#allocation8 + $0x2cc] ss:$16 sps:$4 sm:$0xff]  }
 0x1ec   :  { %3476 = vmatprep.subr.bf16.mxu0 %v5210_v58  ;;  %3562 = vmatprep.subr.bf16.mxu1 %v5213_v61  ;;  %v5244_v58 = vld [vmem:[#allocation8 + $0x2c0] ss:$16 sps:$4 sm:$0xff]   ;;  %v5247_v61 = vld [vmem:[#allocation8 + $0x2c8] ss:$16 sps:$4 sm:$0xff]  }
 0x281   :  { %v2407_v17 = vpop.f32.mrb[0].mxu0  ;;  %v2622_v18 = vpop.f32.mrb[0].mxu1 }
 0x282   :  { %v4561_v23 = vadd.f32 %v2407_v17, %v680_v13  ;;  %v4565_v24 = vadd.f32 %v2622_v18, %v688_v14  ;;  %v2409_v25 = vpop.f32.mrb[1].mxu0  ;;  %v2624_v54 = vpop.f32.mrb[1].mxu1  ;;  %v5261_v17 = vld [vmem:[#allocation8 + $0x30c] ss:$16 sps:$4 sm:$0xff]   ;;  %v5256_v18 = vld [vmem:[#allocation8 + $0x300] ss:$16 sps:$4 sm:$0xff]  }
 0x283   :  { %v4562_v26 = vadd.f32 %v2409_v25, %v684_v15  ;;  %v4566_v27 = vadd.f32 %v2624_v54, %v692_v16  ;;  %v2411_v28 = vpop.f32.mrb[2].mxu0  ;;  %v2626_v52 = vpop.f32.mrb[2].mxu1  ;;  %v5267_v25 = vld [vmem:[#allocation8 + $0x32c] ss:$16 sps:$4 sm:$0xff]   ;;  %v5262_v54 = vld [vmem:[#allocation8 + $0x320] ss:$16 sps:$4 sm:$0xff]  }
 0x284   :  { %5336 = vtanh.f32 %v4561_v23  ;;  %v4563_v53 = vadd.f32 %v2411_v28, %v680_v13  ;;  %v2413_v55 = vpop.f32.mrb[3].mxu0  ;;  %v2628_v59 = vpop.f32.mrb[3].mxu1  ;;  %v4567_v29 = vadd.f32 %v2626_v52, %v688_v14  ;;  %v5255_v13 = vld [vmem:[#allocation8 + $0x2ec] ss:$16 sps:$4 sm:$0xff]   ;;  %v5250_v14 = vld [vmem:[#allocation8 + $0x2e0] ss:$16 sps:$4 sm:$0xff]  }
 0x285   :  { %5338 = vtanh.f32 %v4565_v24  ;;  %v4564_v30 = vadd.f32 %v2413_v55, %v684_v15  ;;  %v4568_v31 = vadd.f32 %v2628_v59, %v692_v16  ;;  %v5253_v15 = vld [vmem:[#allocation8 + $0x2e8] ss:$16 sps:$4 sm:$0xff]   ;;  %v5258_v16 = vld [vmem:[#allocation8 + $0x304] ss:$16 sps:$4 sm:$0xff]   ;;  %v5273_v28 = vld [vmem:[#allocation8 + $0x34c] ss:$16 sps:$4 sm:$0xff]  }
 0x286   :  { %5340 = vtanh.f32 %v4562_v26  ;;  %v5259_v23 = vld [vmem:[#allocation8 + $0x308] ss:$16 sps:$4 sm:$0xff]   ;;  %v5264_v24 = vld [vmem:[#allocation8 + $0x324] ss:$16 sps:$4 sm:$0xff]   ;;  %v5268_v52 = vld [vmem:[#allocation8 + $0x340] ss:$16 sps:$4 sm:$0xff]  }
 0x287   :  { %5342 = vtanh.f32 %v4566_v27  ;;  %v5265_v26 = vld [vmem:[#allocation8 + $0x328] ss:$16 sps:$4 sm:$0xff]   ;;  %v5270_v27 = vld [vmem:[#allocation8 + $0x344] ss:$16 sps:$4 sm:$0xff]   ;;  %v5279_v59 = vld [vmem:[#allocation8 + $0x36c] ss:$16 sps:$4 sm:$0xff]  }
 0x288   :  { %5344 = vtanh.f32 %v4563_v53  ;;  %v5271_v53 = vld [vmem:[#allocation8 + $0x348] ss:$16 sps:$4 sm:$0xff]   ;;  %v5276_v55 = vld [vmem:[#allocation8 + $0x364] ss:$16 sps:$4 sm:$0xff]  }
 0x289   :  { %5346 = vtanh.f32 %v4567_v29  ;;  %v5274_v29 = vld [vmem:[#allocation8 + $0x360] ss:$16 sps:$4 sm:$0xff]  }
 0x28a   :  { %5348 = vtanh.f32 %v4564_v30  ;;  %v5277_v30 = vld [vmem:[#allocation8 + $0x368] ss:$16 sps:$4 sm:$0xff]  }
 0x28b   :  { %5350 = vtanh.f32 %v4568_v31  ;;  %v5282_v31 = vld [vmem:[#allocation8 + $0x384] ss:$16 sps:$4 sm:$0xff]  }
 0x28e   :  { %v5337_v32 = vpop.eup %5336 }
 0x28f   :  { %v5339_v33 = vpop.eup %5338 }
 0x290   :  { %v5341_v34 = vpop.eup %5340 }
 0x291   :  { %v5343_v35 = vpop.eup %5342 }
 0x292   :  { %v5345_v36 = vpop.eup %5344 }
 0x293   :  { %v5347_v37 = vpop.eup %5346  ;;  %v2639_v38 = vpack.c.bf16 %v5345_v36, %v5337_v32  ;;  %v5285_v32 = vld [vmem:[#allocation8 + $0x38c] ss:$16 sps:$4 sm:$0xff]  }
 0x294   :  { %v5349_v39 = vpop.eup %5348  ;;  %v5798_v40 = vpack.c.bf16 %v5347_v37, %v5339_v33  ;;  %v5280_v33 = vld [vmem:[#allocation8 + $0x380] ss:$16 sps:$4 sm:$0xff]   ;;  %v5291_v36 = vld [vmem:[#allocation8 + $0x3ac] ss:$16 sps:$4 sm:$0xff]  }
 0x295   :  { %v5351_v41 = vpop.eup %5350  ;;  %v2640_v42 = vpack.c.bf16 %v5349_v39, %v5341_v34  ;;  %v5283_v34 = vld [vmem:[#allocation8 + $0x388] ss:$16 sps:$4 sm:$0xff]   ;;  %v5286_v37 = vld [vmem:[#allocation8 + $0x3a0] ss:$16 sps:$4 sm:$0xff]   ;;  %v5294_v39 = vld [vmem:[#allocation8 + $0x3c4] ss:$16 sps:$4 sm:$0xff]  }
 0x296   :  { %v2642_v45 = vpack.c.bf16 %v5351_v41, %v5343_v35  ;;  %v5288_v35 = vld [vmem:[#allocation8 + $0x3a4] ss:$16 sps:$4 sm:$0xff]   ;;  %v5297_v41 = vld [vmem:[#allocation8 + $0x3cc] ss:$16 sps:$4 sm:$0xff]  }
 0x297   :  { %3465 = vmatprep.mubr.bf16.mxu0 %v2640_v42  ;;  %3551 = vmatprep.mubr.bf16.mxu1 %v2640_v42  ;;  %v5292_v42 = vld [vmem:[#allocation8 + $0x3c0] ss:$16 sps:$4 sm:$0xff]  }
 0x298   :  { %3466 = vmatmul.mubr.bf16.vlgmr.msra.gmra.mrb[4].mxu0 %v2639_v38  ;;  %3552 = vmatmul.mubr.bf16.vlgmr.msra.gmra.mrb[4].mxu1 %v2639_v38  ;;  %v5289_v38 = vld [vmem:[#allocation8 + $0x3a8] ss:$16 sps:$4 sm:$0xff]  }
 0x299   :  { %3477 = vmatpush1.bf16.msra.mxu0 %v5208_v43  ;;  %3563 = vmatpush1.bf16.msra.mxu1 %v5211_v44  ;;  %v5295_v43 = vld [vmem:[#allocation8 + $0x3c8] ss:$16 sps:$4 sm:$0xff]   ;;  %v5300_v44 = vld [vmem:[#allocation8 + $0x3e4] ss:$16 sps:$4 sm:$0xff]  }
 0x29a   :  { %3508 = vmatprep.mubr.bf16.mxu0 %v2642_v45  ;;  %3594 = vmatprep.mubr.bf16.mxu1 %v2642_v45  ;;  %v5303_v45 = vld [vmem:[#allocation8 + $0x3ec] ss:$16 sps:$4 sm:$0xff]  }
 0x29b   :  { %3478 = vmatprep.subr.bf16.mxu0 %v5216_v19  ;;  %3564 = vmatprep.subr.bf16.mxu1 %v5219_v20  ;;  %v5298_v19 = vld [vmem:[#allocation8 + $0x3e0] ss:$16 sps:$4 sm:$0xff]   ;;  %v5301_v20 = vld [vmem:[#allocation8 + $0x3e8] ss:$16 sps:$4 sm:$0xff]  }
 0x29d   :  { %3479 = vmatpush1.bf16.msra.mxu0 %v5214_v21  ;;  %3565 = vmatpush1.bf16.msra.mxu1 %v5217_v22  ;;  %v5304_v21 = vld [vmem:[#allocation11 + $0x40] sm:$0xff]  }
 0x29e   :  { %3480 = vmatprep.subr.bf16.mxu0 %v5222_v46  ;;  %3566 = vmatprep.subr.bf16.mxu1 %v5225_v47  ;;  %v5305_v22 = vld [vmem:[#allocation11 + $0xc0] sm:$0xff]  }
 0x29f   :  { %v5306_v46 = vld [vmem:[#allocation11] sm:$0xff]  }
 0x2a0   :  { %v5307_v47 = vld [vmem:[#allocation11 + $0x80] sm:$0xff]  }
 0x2a1   :  { %3481 = vmatpush1.bf16.msra.mxu0 %v5220_v49  ;;  %3567 = vmatpush1.bf16.msra.mxu1 %v5223_v50  ;;  %v5308_v49 = vld [vmem:[#allocation11 + $0x48] sm:$0xff]  }
 0x2a2   :  { %3482 = vmatprep.subr.bf16.mxu0 %v5228_v51  ;;  %3568 = vmatprep.subr.bf16.mxu1 %v5231_v60  ;;  %v5309_v50 = vld [vmem:[#allocation11 + $0xc8] sm:$0xff]  }
 0x2a3   :  { %v5310_v51 = vld [vmem:[#allocation11 + $0x8] sm:$0xff]  }
 0x2a4   :  { %v5311_v60 = vld [vmem:[#allocation11 + $0x88] sm:$0xff]  }
 0x2a5   :  { %3483 = vmatpush1.bf16.msra.mxu0 %v5226_v62  ;;  %3569 = vmatpush1.bf16.msra.mxu1 %v5229_v63  ;;  %v5312_v62 = vld [vmem:[#allocation11 + $0x50] sm:$0xff]  }
 0x2a6   :  { %3484 = vmatprep.subr.bf16.mxu0 %v5234_v0  ;;  %3570 = vmatprep.subr.bf16.mxu1 %v5237_v1  ;;  %v5313_v63 = vld [vmem:[#allocation11 + $0xd0] sm:$0xff]  }
 0x2a7   :  { %v5314_v0 = vld [vmem:[#allocation11 + $0x10] sm:$0xff]  }
 0x2a8   :  { %v5315_v1 = vld [vmem:[#allocation11 + $0x90] sm:$0xff]  }
 0x2a9   :  { %3485 = vmatpush1.bf16.msra.mxu0 %v5232_v2  ;;  %3571 = vmatpush1.bf16.msra.mxu1 %v5235_v3  ;;  %v5316_v2 = vld [vmem:[#allocation11 + $0x58] sm:$0xff]  }
 0x2aa   :  { %3486 = vmatprep.subr.bf16.mxu0 %v5240_v4  ;;  %3572 = vmatprep.subr.bf16.mxu1 %v5243_v5  ;;  %v5317_v3 = vld [vmem:[#allocation11 + $0xd8] sm:$0xff]   ;;  %v5320_v5 = vld [vmem:[#allocation11 + $0x60] sm:$0xff]  }
 0x2ab   :  { %v5319_v4 = vld [vmem:[#allocation11 + $0x98] sm:$0xff]  }
 0x2ad   :  { %3487 = vmatpush1.bf16.msra.mxu0 %v5238_v6  ;;  %3573 = vmatpush1.bf16.msra.mxu1 %v5241_v7  ;;  %v5321_v6 = vld [vmem:[#allocation11 + $0xe0] sm:$0xff]  }
 0x2ae   :  { %3488 = vmatprep.subr.bf16.mxu0 %v5246_v56  ;;  %3574 = vmatprep.subr.bf16.mxu1 %v5249_v57  ;;  %v5322_v7 = vld [vmem:[#allocation11 + $0x20] sm:$0xff]   ;;  %v5324_v57 = vld [vmem:[#allocation11 + $0x68] sm:$0xff]  }
 0x2af   :  { %v5323_v56 = vld [vmem:[#allocation11 + $0xa0] sm:$0xff]  }
 0x2b1   :  { %3489 = vmatpush1.bf16.msra.mxu0 %v5244_v58  ;;  %3575 = vmatpush1.bf16.msra.mxu1 %v5247_v61  ;;  %v5325_v58 = vld [vmem:[#allocation11 + $0xe8] sm:$0xff]  }
 0x2b2   :  { %3490 = vmatprep.subr.bf16.mxu0 %v5252_v10  ;;  %3576 = vmatprep.subr.bf16.mxu1 %v5255_v13  ;;  %v5326_v61 = vld [vmem:[#allocation11 + $0x28] sm:$0xff]   ;;  %v5328_v13 = vld [vmem:[#allocation11 + $0x70] sm:$0xff]  }
 0x2b3   :  { %v5327_v10 = vld [vmem:[#allocation11 + $0xa8] sm:$0xff]  }
 0x2b5   :  { %3491 = vmatpush1.bf16.msra.mxu0 %v5250_v14  ;;  %3577 = vmatpush1.bf16.msra.mxu1 %v5253_v15  ;;  %v5329_v14 = vld [vmem:[#allocation11 + $0xf0] sm:$0xff]  }
 0x2b6   :  { %3492 = vmatprep.subr.bf16.mxu0 %v5258_v16  ;;  %3578 = vmatprep.subr.bf16.mxu1 %v5261_v17  ;;  %v5330_v15 = vld [vmem:[#allocation11 + $0x30] sm:$0xff]   ;;  %v5332_v17 = vld [vmem:[#allocation11 + $0x78] sm:$0xff]  }
 0x2b7   :  { %v5331_v16 = vld [vmem:[#allocation11 + $0xb0] sm:$0xff]  }
 0x2b9   :  { %3493 = vmatpush1.bf16.msra.mxu0 %v5256_v18  ;;  %3579 = vmatpush1.bf16.msra.mxu1 %v5259_v23  ;;  %v5333_v18 = vld [vmem:[#allocation11 + $0xf8] sm:$0xff]  }
 0x2ba   :  { %3494 = vmatprep.subr.bf16.mxu0 %v5264_v24  ;;  %3580 = vmatprep.subr.bf16.mxu1 %v5267_v25  ;;  %v5334_v23 = vld [vmem:[#allocation11 + $0x38] sm:$0xff]  }
 0x2bb   :  { %v5335_v24 = vld [vmem:[#allocation11 + $0xb8] sm:$0xff]  }
 0x2bc   :  { %v2771_v25 = vld [vmem:[#allocation10] sm:$0xf] }
 0x2bd   :  { %3495 = vmatpush1.bf16.msra.mxu0 %v5262_v54  ;;  %3581 = vmatpush1.bf16.msra.mxu1 %v5265_v26  ;;  %v2776_v54 = vrot.slane %v2771_v25, %v679_v8  ;;  %v2784_v26 = vrot.slane %v2771_v25, %v687_v9 }
 0x2be   :  { %3496 = vmatprep.subr.bf16.mxu0 %v5270_v27  ;;  %3582 = vmatprep.subr.bf16.mxu1 %v5273_v28  ;;  %v2780_v27 = vrot.slane %v2771_v25, %v683_v11  ;;  %v2788_v28 = vrot.slane %v2771_v25, %v691_v12 }
 0x2c1   :  { %3497 = vmatpush1.bf16.msra.mxu0 %v5268_v52  ;;  %3583 = vmatpush1.bf16.msra.mxu1 %v5271_v53 }
 0x2c2   :  { %3498 = vmatprep.subr.bf16.mxu0 %v5276_v55  ;;  %3584 = vmatprep.subr.bf16.mxu1 %v5279_v59 }
 0x2c5   :  { %3499 = vmatpush1.bf16.msra.mxu0 %v5274_v29  ;;  %3585 = vmatpush1.bf16.msra.mxu1 %v5277_v30 }
 0x2c6   :  { %3500 = vmatprep.subr.bf16.mxu0 %v5282_v31  ;;  %3586 = vmatprep.subr.bf16.mxu1 %v5285_v32 }
 0x2c9   :  { %3501 = vmatpush1.bf16.msra.mxu0 %v5280_v33  ;;  %3587 = vmatpush1.bf16.msra.mxu1 %v5283_v34 }
 0x2ca   :  { %3502 = vmatprep.subr.bf16.mxu0 %v5288_v35  ;;  %3588 = vmatprep.subr.bf16.mxu1 %v5291_v36 }
 0x2cd   :  { %3503 = vmatpush1.bf16.msra.mxu0 %v5286_v37  ;;  %3589 = vmatpush1.bf16.msra.mxu1 %v5289_v38 }
 0x2ce   :  { %3504 = vmatprep.subr.bf16.mxu0 %v5294_v39  ;;  %3590 = vmatprep.subr.bf16.mxu1 %v5297_v41 }
 0x2d1   :  { %3505 = vmatpush1.bf16.msra.mxu0 %v5292_v42  ;;  %3591 = vmatpush1.bf16.msra.mxu1 %v5295_v43 }
 0x2d2   :  { %3506 = vmatprep.subr.bf16.mxu0 %v5300_v44  ;;  %3592 = vmatprep.subr.bf16.mxu1 %v5303_v45 }
 0x2d5   :  { %3507 = vmatpush1.bf16.msra.mxu0 %v5298_v19  ;;  %3593 = vmatpush1.bf16.msra.mxu1 %v5301_v20 }
 0x2d6   :  { %4517 = vmatprep.subr.bf16.mxu0 %v5304_v21  ;;  %4539 = vmatprep.subr.bf16.mxu1 %v5305_v22 }
 0x2d8   :  { %3509 = vmatmul.mubr.bf16.vlgmr.msra.gmra.mrb[4].mxu0 %v5798_v40  ;;  %3595 = vmatmul.mubr.bf16.vlgmr.msra.gmra.mrb[4].mxu1 %v5798_v40  ;;  %v5318_v40 = vld [vmem:[#allocation11 + $0x18] sm:$0xff]  }
 0x2d9   :  { %4518 = vmatpush3.bf16.msra.mxu0 %v5306_v46  ;;  %4540 = vmatpush3.bf16.msra.mxu1 %v5307_v47  ;;  %v5568_v47 = vmov 1966171168  }
 0x2da   :  { %4519 = vmatprep.subr.bf16.mxu0 %v5308_v49  ;;  %4541 = vmatprep.subr.bf16.mxu1 %v5309_v50  ;;  %v3966_v49 = vunpack.c.l.s4 %v5568_v47 }
 0x2dd   :  { %4520 = vmatpush3.bf16.msra.mxu0 %v5310_v51  ;;  %4542 = vmatpush3.bf16.msra.mxu1 %v5311_v60  ;;  %v4479_v51 = vld [vmem:[#allocation13] ss:$0 sm:$0xff] }
 0x2de   :  { %4521 = vmatprep.subr.bf16.mxu0 %v5312_v62  ;;  %4543 = vmatprep.subr.bf16.mxu1 %v5313_v63 }
 0x2e1   :  { %4522 = vmatpush3.bf16.msra.mxu0 %v5314_v0  ;;  %4544 = vmatpush3.bf16.msra.mxu1 %v5315_v1 }
 0x2e2   :  { %4523 = vmatprep.subr.bf16.mxu0 %v5316_v2  ;;  %4545 = vmatprep.subr.bf16.mxu1 %v5317_v3 }
 0x2e5   :  { %4524 = vmatpush3.bf16.msra.mxu0 %v5318_v40  ;;  %4546 = vmatpush3.bf16.msra.mxu1 %v5319_v4 }
 0x2e6   :  { %4525 = vmatprep.subr.bf16.mxu0 %v5320_v5  ;;  %4547 = vmatprep.subr.bf16.mxu1 %v5321_v6  ;;  %v3967_v6 = vunpack.c.0.s8 %v3966_v49 }
 0x2e9   :  { %4526 = vmatpush3.bf16.msra.mxu0 %v5322_v7  ;;  %4548 = vmatpush3.bf16.msra.mxu1 %v5323_v56 }
 0x2ea   :  { %4527 = vmatprep.subr.bf16.mxu0 %v5324_v57  ;;  %4549 = vmatprep.subr.bf16.mxu1 %v5325_v58 }
 0x2ed   :  { %4528 = vmatpush3.bf16.msra.mxu0 %v5326_v61  ;;  %4550 = vmatpush3.bf16.msra.mxu1 %v5327_v10  ;;  %v3970_v61 = vsub.s32 %v3967_v6, %v5697_v48 }
 0x2ee   :  { %4529 = vmatprep.subr.bf16.mxu0 %v5328_v13  ;;  %4551 = vmatprep.subr.bf16.mxu1 %v5329_v14 }
 0x2f1   :  { %4530 = vmatpush3.bf16.msra.mxu0 %v5330_v15  ;;  %4552 = vmatpush3.bf16.msra.mxu1 %v5331_v16 }
 0x2f2   :  { %4531 = vmatprep.subr.bf16.mxu0 %v5332_v17  ;;  %4553 = vmatprep.subr.bf16.mxu1 %v5333_v18 }
 0x2f5   :  { %4532 = vmatpush3.bf16.msra.mxu0 %v5334_v23  ;;  %4554 = vmatpush3.bf16.msra.mxu1 %v5335_v24 }
 0x3ab   :  { %v3510_v52 = vpop.f32.mrb[4].mxu0  ;;  %v3596_v53 = vpop.f32.mrb[4].mxu1 }
 0x3ac   :  { %v4569_v55 = vadd.f32 %v3510_v52, %v2776_v54  ;;  %v4573_v59 = vadd.f32 %v3596_v53, %v2784_v26  ;;  %v3512_v29 = vpop.f32.mrb[5].mxu0  ;;  %v3598_v30 = vpop.f32.mrb[5].mxu1 }
 0x3ad   :  { %v4570_v31 = vadd.f32 %v3512_v29, %v2780_v27  ;;  %v4574_v32 = vadd.f32 %v3598_v30, %v2788_v28  ;;  %v3514_v33 = vpop.f32.mrb[6].mxu0  ;;  %v3600_v34 = vpop.f32.mrb[6].mxu1 }
 0x3ae   :  { %5352 = vtanh.f32 %v4569_v55  ;;  %v4571_v8 = vadd.f32 %v3514_v33, %v2776_v54  ;;  %v3516_v35 = vpop.f32.mrb[7].mxu0  ;;  %v3602_v9 = vpop.f32.mrb[7].mxu1  ;;  %v4575_v36 = vadd.f32 %v3600_v34, %v2784_v26 }
 0x3af   :  { %5354 = vtanh.f32 %v4573_v59  ;;  %v4572_v11 = vadd.f32 %v3516_v35, %v2780_v27  ;;  %v4576_v12 = vadd.f32 %v3602_v9, %v2788_v28 }
 0x3b0   :  { %5356 = vtanh.f32 %v4570_v31 }
 0x3b1   :  { %5358 = vtanh.f32 %v4574_v32 }
 0x3b2   :  { %5360 = vtanh.f32 %v4571_v8 }
 0x3b3   :  { %5362 = vtanh.f32 %v4575_v36 }
 0x3b4   :  { %5364 = vtanh.f32 %v4572_v11 }
 0x3b5   :  { %5366 = vtanh.f32 %v4576_v12 }
 0x3b8   :  { %v5353_v37 = vpop.eup %5352 }
 0x3b9   :  { %v5355_v38 = vpop.eup %5354 }
 0x3ba   :  { %v5357_v39 = vpop.eup %5356 }
 0x3bb   :  { %v5359_v41 = vpop.eup %5358 }
 0x3bc   :  { %v5361_v42 = vpop.eup %5360 }
 0x3bd   :  { %v5363_v43 = vpop.eup %5362  ;;  %v3613_v44 = vpack.c.bf16 %v5361_v42, %v5353_v37 }
 0x3be   :  { %v5365_v45 = vpop.eup %5364  ;;  %v3615_v19 = vpack.c.bf16 %v5363_v43, %v5355_v38 }
 0x3bf   :  { %v5367_v20 = vpop.eup %5366  ;;  %v3614_v21 = vpack.c.bf16 %v5365_v45, %v5357_v39 }
 0x3c0   :  { %v3616_v22 = vpack.c.bf16 %v5367_v20, %v5359_v41 }
 0x3c1   :  { %3912 = vmatprep.mubr.bf16.mxu0 %v3614_v21 }
 0x3c2   :  { %3953 = vmatprep.mubr.bf16.mxu1 %v3616_v22  ;;  %3913 = vmatmul.mubr.bf16.vlgmr.msra.gmra.mrb[8].mxu0 %v3613_v44 }
 0x3c3   :  { %3954 = vmatmul.mubr.bf16.vlgmr.msra.gmra.mrb[8].mxu1 %v3615_v19 }
 0x495   :  { %v4533_v46 = vpop.f32.mrb[8].mxu0 }
 0x496   :  { %v4555_v50 = vpop.f32.mrb[8].mxu1  ;;  %v4534_v60 = vpop.f32.mrb[9].mxu0 }
 0x497   :  { %v4535_v62 = vadd.f32 %v4534_v60, %v4533_v46  ;;  %v4556_v63 = vpop.f32.mrb[9].mxu1  ;;  %v4536_v0 = vpop.f32.mrb[10].mxu0 }
 0x498   :  { %v4557_v1 = vadd.f32 %v4556_v63, %v4555_v50  ;;  %v4558_v2 = vpop.f32.mrb[10].mxu1  ;;  %v4537_v3 = vpop.f32.mrb[11].mxu0 }
 0x499   :  { %v3915_v40 = vadd.f32 %v4535_v62, %v4479_v51  ;;  %v4538_v4 = vadd.f32 %v4537_v3, %v4536_v0  ;;  %v4559_v5 = vpop.f32.mrb[11].mxu1 }
 0x49a   :  { %v4560_v7 = vadd.f32 %v4559_v5, %v4558_v2 }
 0x49b   :  { %v3956_v56 = vadd.f32 %v4557_v1, %v3915_v40  ;;  %v3918_v57 = vadd.f32 %v4538_v4, %v4479_v51 }
 0x49d   :  { %v3959_v58 = vadd.f32 %v4560_v7, %v3918_v57 }
 0x49f   :  { %v3962_v10 = vpack.c.bf16 %v3959_v58, %v3956_v56  ;;  %v4512_v13 = vpack.c.bf16 %v3959_v58, %v3959_v58 }
 0x4a1   :  { %v3971_v14 = vrot.slane %v3962_v10, %v3970_v61  ;;  %v3978_v15 = vrot.slane %v4512_v13, %v3970_v61 }
 0x4a3   :  { %v3979_v16 = vcombine.high %v3971_v14, %v3971_v14  ;;  %v3980_v17 = vcombine.high %v3978_v15, %v3978_v15  ;;  %v3987_v18 = vrot.slane %v3971_v14, %v3970_v61  ;;  %v3994_v23 = vrot.slane %v3978_v15, %v3970_v61  ;;  %4513 = vst.sshfl [vmem:[#allocation14] sm:$0x1 pattern:$0x73625140] %v3971_v14 }
 0x4a4   :  { %4515 = vst.sshfl [vmem:[#allocation14 + $0x4] sm:$0x1 pattern:$0x73625140] %v3978_v15 }
 0x4a5   :  { %v4001_v24 = vrot.slane %v3979_v16, %v3970_v61  ;;  %v4008_v25 = vrot.slane %v3980_v17, %v3970_v61  ;;  %v4009_v54 = vcombine.high %v3987_v18, %v3987_v18  ;;  %v4010_v26 = vcombine.high %v3994_v23, %v3994_v23  ;;  %4514 = vst.sshfl [vmem:[#allocation14 + $0x1] sm:$0x1 pattern:$0x73625140] %v3979_v16 }
 0x4a6   :  { %4516 = vst.sshfl [vmem:[#allocation14 + $0x5] sm:$0x1 pattern:$0x73625140] %v3980_v17 }
 0x4a7   :  { %v4011_v27 = vcombine.high %v4001_v24, %v4001_v24  ;;  %v4012_v28 = vcombine.high %v4008_v25, %v4008_v25  ;;  %4023 = vst [vmem:[#allocation14 + $0x2] sm:$0x1] %v4009_v54  ;;  %4027 = vst [vmem:[#allocation14 + $0x6] sm:$0x1] %v4010_v26 }
 0x4a9   :  { %4024 = vst [vmem:[#allocation14 + $0x3] sm:$0x1] %v4011_v27  ;;  %4028 = vst [vmem:[#allocation14 + $0x7] sm:$0x1] %v4012_v28 }
 0x4aa   :  { %4033 = vsyncadd [#allocation4], 112  ;;  %s5569_s6 = smov [#allocation14]  }
 0x4ab   :  { %s4034_s16 = sshll.u32 %s5569_s6, 4  ;;  %s4035_s16 = int_to_ptr.vmem [resolvable:$true] %s4034_s16 }
 0x4ac   :  { %s5522_s17 = scalar_lea.vmem %s4035_s16, 16  ;;  %s5526_s0 = scalar_lea.vmem %s4035_s16, 128 }
 0x4ad   :  { %p5523_p0 = scmp.ne.s32.totalorder %s4035_s16, %s5522_s17  ;;  %p5527_p1 = scmp.lt.s32.totalorder %s4035_s16, %s4035_s16 }
 0x4ae   :  { %p5528_p2 = scmp.lt.s32.totalorder %s5526_s0, %s5522_s17 }
 0x4b0   :  { %p5529_p3 = por %p5528_p2, %p5527_p1 }
 0x4b2   :  { %p5530_p4 = pnand %p5529_p3, %p5523_p0 }
 0x4b4   :  { %5533 = shalt.err (!%p5530_p4)
}
 0x4b5   :  { %s5534_s21 = scalar_lea.hbm %s5832_s7, 16 }
 0x4b6   :  { %p5535_p5 = scmp.ne.s32.totalorder %s5832_s7, %s5534_s21  ;;  %p5538_p6 = scmp.lt.u32.totalorder %s5534_s21, %s5832_s7 }
 0x4b8   :  { %p5540_p7 = pnand %p5538_p6, %p5535_p5 }
 0x4ba   :  { %5543 = shalt.err (!%p5540_p7)
}
 0x4bb   :  { %s5570_s1 = smov 1  }
 0x4bc   :  { %4040 = dma.vmem_to_hbm [thread:$0]  %s4035_s16, 16, %s5832_s7, [#allocation4], %s5556_s12, %s5556_s12, %s5570_s1  }
 0x4bd   :  { %5552 = dma.done.wait [#allocation4], 128  }
 0x4be   :  { %5553 = vsyncadd [#allocation4], 4294967168 }
 0x4bf   :  { %4044 = vsyncpa [#allocation3], 1 }
 0x4c0   :  { %4045 = vsyncpa [#allocation6], 1 }
 0x4c1   :  { %4046 = vsyncpa [#allocation9], 1 }
 0x4c2   :  { %4047 = vsyncpa [#allocation12], 1 }
 0x4c3   :  { %4048 = vsyncpa [#allocation4], 1 }

</bundles_post_ra>
